<compile_context>
chip_gen: v6e
topology: v6e:2x2x1
jax: 0.10.0
libtpu: 0.0.40
codegen_flags: <defaults>
</compile_context>

<pallas_src>
import jax
import jax.numpy as jnp
from jax.experimental import pallas as pl
from jax.experimental.pallas import tpu as pltpu


# ----------------------------------------------------------------------------
# Fused (conv1x1+BN+ReLU) -> (conv1x1+BN+ReLU) kernel, per (branch, row-tile)
# ----------------------------------------------------------------------------
def _fused_down_up_kernel(x_ref, w1_ref, s1_ref, w2_ref, s2_ref,
                          res_ref, con_ref):
    # x_ref:  (tm, Cin)     activation tile (channels-last)
    # w1_ref: (Cin, Cp)     down weight with BN scale folded in
    # s1_ref: (1, Cp)       down BN shift
    # w2_ref: (Cp, Cp)      up weight with BN scale folded in
    # s2_ref: (1, Cp)       up BN shift
    y1 = jnp.dot(x_ref[...], w1_ref[...], preferred_element_type=jnp.float32)
    y1 = jnp.maximum(y1 + s1_ref[...], 0.0)
    res_ref[...] = y1.astype(res_ref.dtype)

    y2 = jnp.dot(y1.astype(w2_ref.dtype), w2_ref[...],
                 preferred_element_type=jnp.float32)
    con_ref[...] = jnp.maximum(y2 + s2_ref[...], 0.0).astype(con_ref.dtype)


# ----------------------------------------------------------------------------
# BN folding: Conv(bias=False) + BatchNorm(eval) == x @ (W*scale) + shift
# ----------------------------------------------------------------------------
def _fold_bn(w, gamma, beta, mean, var, eps=1e-5):
    # w: PyTorch conv weight (Cout, Cin, 1, 1)  ->  (Cin, Cout) scaled
    cout, cin = w.shape[0], w.shape[1]
    inv_std = 1.0 / jnp.sqrt(var + eps)
    scale = gamma * inv_std                                # (Cout,)
    w2d = w.reshape(cout, cin).T * scale[None, :]          # (Cin, Cout)
    shift = (beta - mean * scale).reshape(1, cout)         # (1, Cout)
    return w2d, shift


# ----------------------------------------------------------------------------
# contrast_head forward (attention == "none")
# ----------------------------------------------------------------------------
def contrast_head_forward(params, xs, *, tm_target=1024, eps=1e-5):
    """xs: list of 3 NCHW tensors. Returns (_res, _con) like the PyTorch module."""
    nb = len(xs)
    N, Cin, H, W = xs[0].shape
    Cp = params["down"][0]["w"].shape[0]     # pre_dim
    M = N * H * W

    # NCHW -> NHWC -> (M, Cin), stacked over branches: (nb, M, Cin)
    x_st = jnp.stack(
        [jnp.transpose(x, (0, 2, 3, 1)).reshape(M, Cin) for x in xs], axis=0)

    w1s, s1s, w2s, s2s = [], [], [], []
    for i in range(nb):
        pd, pu = params["down"][i], params["up"][i]
        w1, s1 = _fold_bn(pd["w"], pd["gamma"], pd["beta"], pd["mean"], pd["var"], eps)
        w2, s2 = _fold_bn(pu["w"], pu["gamma"], pu["beta"], pu["mean"], pu["var"], eps)
        w1s.append(w1); s1s.append(s1); w2s.append(w2); s2s.append(s2)
    w1_st = jnp.stack(w1s)   # (nb, Cin, Cp)
    s1_st = jnp.stack(s1s)   # (nb, 1,  Cp)
    w2_st = jnp.stack(w2s)   # (nb, Cp, Cp)
    s2_st = jnp.stack(s2s)   # (nb, 1,  Cp)

    # Row tile: as large as useful, multiple of 8 sublanes; ragged M is padded.
    m8 = ((M + 7) // 8) * 8
    tm = min(((tm_target + 7) // 8) * 8, m8)
    num_m_tiles = pl.cdiv(M, tm)
    M_pad = num_m_tiles * tm
    if M_pad != M:
        x_st = jnp.pad(x_st, ((0, 0), (0, M_pad - M), (0, 0)))

    # Explicit VMEM budget: double-buffered x tile + 2 double-buffered output
    # tiles + resident weights/shifts.  Stay well under v7x's 64 MiB.
    elt = 4
    needed = (2 * tm * Cin
              + 2 * (Cin * Cp + Cp * Cp + 2 * Cp)
              + 2 * 2 * tm * Cp) * elt
    vmem_limit = int(min(48 * 1024 * 1024, max(16 * 1024 * 1024, 4 * needed)))

    grid = (nb, num_m_tiles)
    res_flat, con_flat = pl.pallas_call(
        _fused_down_up_kernel,
        out_shape=(jax.ShapeDtypeStruct((nb, M_pad, Cp), x_st.dtype),
                   jax.ShapeDtypeStruct((nb, M_pad, Cp), x_st.dtype)),
        grid_spec=pltpu.PrefetchScalarGridSpec(
            num_scalar_prefetch=0,
            grid=grid,
            in_specs=[
                pl.BlockSpec((None, tm, Cin), lambda b, i: (b, i, 0)),  # x tile
                pl.BlockSpec((None, Cin, Cp), lambda b, i: (b, 0, 0)),  # W1'
                pl.BlockSpec((None, 1, Cp),   lambda b, i: (b, 0, 0)),  # shift1
                pl.BlockSpec((None, Cp, Cp),  lambda b, i: (b, 0, 0)),  # W2'
                pl.BlockSpec((None, 1, Cp),   lambda b, i: (b, 0, 0)),  # shift2
            ],
            out_specs=[
                pl.BlockSpec((None, tm, Cp), lambda b, i: (b, i, 0)),   # _res
                pl.BlockSpec((None, tm, Cp), lambda b, i: (b, i, 0)),   # _con
            ],
        ),
        compiler_params=pltpu.CompilerParams(
            dimension_semantics=("parallel", "parallel"),
            vmem_limit_bytes=vmem_limit),
    )(x_st, w1_st, s1_st, w2_st, s2_st)

    # (M, Cp) -> NHWC -> NCHW, per branch (single layout conversion at exit)
    def to_nchw(flat):
        return jnp.transpose(flat[:M].reshape(N, H, W, Cp), (0, 3, 1, 2))

    _res = [to_nchw(res_flat[i]) for i in range(nb)]
    _con = [to_nchw(con_flat[i]) for i in range(nb)]
    # TODO(synk): CBAMBlock / ScaledDotProductAttention branches not implemented
    # (their class definitions are not part of the provided module).
    return _res, _con


# ----------------------------------------------------------------------------
# Deterministic synthetic parameters: 3 ASPPDown + 3 ASPPUp branches
# ----------------------------------------------------------------------------
def init_contrast_head_params(key, in_channels, pre_dim):
    params = {"down": [], "up": []}
    for i in range(3):
        k = jax.random.fold_in(key, i)
        kd, ku = jax.random.split(k)
        kdw, kdg, kdb, kdm, kdv = jax.random.split(kd, 5)
        kuw, kug, kub, kum, kuv = jax.random.split(ku, 5)
        params["down"].append(dict(
            w=jax.random.normal(kdw, (pre_dim, in_channels, 1, 1), jnp.float32) * 0.1,
            gamma=1.0 + 0.1 * jax.random.normal(kdg, (pre_dim,), jnp.float32),
            beta=0.1 * jax.random.normal(kdb, (pre_dim,), jnp.float32),
            mean=0.1 * jax.random.normal(kdm, (pre_dim,), jnp.float32),
            var=0.5 + jax.random.uniform(kdv, (pre_dim,), jnp.float32),
        ))
        params["up"].append(dict(
            w=jax.random.normal(kuw, (pre_dim, pre_dim, 1, 1), jnp.float32) * 0.1,
            gamma=1.0 + 0.1 * jax.random.normal(kug, (pre_dim,), jnp.float32),
            beta=0.1 * jax.random.normal(kub, (pre_dim,), jnp.float32),
            mean=0.1 * jax.random.normal(kum, (pre_dim,), jnp.float32),
            var=0.5 + jax.random.uniform(kuv, (pre_dim,), jnp.float32),
        ))
    return params


# ----------------------------------------------------------------------------
# Pure-JAX reference for correctness checking
# ----------------------------------------------------------------------------
def _ref_conv_bn_relu(x_nchw, p, eps=1e-5):
    N, Cin, H, W = x_nchw.shape
    Cout = p["w"].shape[0]
    x_flat = jnp.transpose(x_nchw, (0, 2, 3, 1)).reshape(-1, Cin)
    y = x_flat @ p["w"].reshape(Cout, Cin).T
    y = (y - p["mean"]) / jnp.sqrt(p["var"] + eps) * p["gamma"] + p["beta"]
    y = jnp.maximum(y, 0.0)
    return jnp.transpose(y.reshape(N, H, W, Cout), (0, 3, 1, 2))


if __name__ == "__main__":
    key = jax.random.PRNGKey(0)
    # Small synthetic shapes; pre_dim=128 keeps the channel axis lane-dense.
    N, IN_CH, PRE_DIM, H, W = 2, 8, 128, 16, 16

    kx, kp = jax.random.split(key)
    xs = [jax.random.normal(jax.random.fold_in(kx, i), (N, IN_CH, H, W), jnp.float32)
          for i in range(3)]
    params = init_contrast_head_params(kp, IN_CH, PRE_DIM)

    res, con = contrast_head_forward(params, xs)
    jax.block_until_ready((res, con))

    # Verify against a pure-JAX reference
    for i in range(3):
        r_ref = _ref_conv_bn_relu(xs[i], params["down"][i])
        c_ref = _ref_conv_bn_relu(r_ref, params["up"][i])
        assert res[i].shape == (N, PRE_DIM, H, W)
        assert con[i].shape == (N, PRE_DIM, H, W)
        assert jnp.allclose(res[i], r_ref, atol=1e-4, rtol=1e-4), f"res[{i}] mismatch"
        assert jnp.allclose(con[i], c_ref, atol=1e-4, rtol=1e-4), f"con[{i}] mismatch"

    print("KERNEL_OK")
</pallas_src>

<mosaic_0001>
module attributes {stable_mosaic.version = 11 : i64} {
  func.func @_fused_down_up_kernel(%arg0: i32, %arg1: i32, %arg2: memref<1x512x8xf32, #tpu.memory_space<vmem>>, %arg3: memref<1x8x128xf32, #tpu.memory_space<vmem>>, %arg4: memref<1x1x128xf32, #tpu.memory_space<vmem>>, %arg5: memref<1x128x128xf32, #tpu.memory_space<vmem>>, %arg6: memref<1x1x128xf32, #tpu.memory_space<vmem>>, %arg7: memref<1x512x128xf32, #tpu.memory_space<vmem>>, %arg8: memref<1x512x128xf32, #tpu.memory_space<vmem>>) attributes {dimension_semantics = [#tpu.dimension_semantics<parallel>, #tpu.dimension_semantics<parallel>], iteration_bounds = array<i64: 3, 1>, scalar_prefetch = 0 : i64, scratch_operands = 0 : i64, tpu.core_type = #tpu.core_type<tc>, window_params = [{transform_indices = @transform_0, window_bounds = array<i64: 1, 512, 8>}, {transform_indices = @transform_1, window_bounds = array<i64: 1, 8, 128>}, {transform_indices = @transform_2, window_bounds = array<i64: 1, 1, 128>}, {transform_indices = @transform_3, window_bounds = array<i64: 1, 128, 128>}, {transform_indices = @transform_4, window_bounds = array<i64: 1, 1, 128>}, {transform_indices = @transform_5, window_bounds = array<i64: 1, 512, 128>}, {transform_indices = @transform_6, window_bounds = array<i64: 1, 512, 128>}]} {
    %c0 = arith.constant 0 : index
    %c0_0 = arith.constant 0 : index
    %c0_1 = arith.constant 0 : index
    %0 = vector.load %arg2[%c0, %c0_0, %c0_1] : memref<1x512x8xf32, #tpu.memory_space<vmem>>, vector<1x512x8xf32>
    %1 = vector.shape_cast %0 : vector<1x512x8xf32> to vector<512x8xf32>
    %c0_2 = arith.constant 0 : index
    %c0_3 = arith.constant 0 : index
    %c0_4 = arith.constant 0 : index
    %2 = vector.load %arg3[%c0_2, %c0_3, %c0_4] : memref<1x8x128xf32, #tpu.memory_space<vmem>>, vector<1x8x128xf32>
    %3 = vector.shape_cast %2 : vector<1x8x128xf32> to vector<8x128xf32>
    %cst = arith.constant dense<0.000000e+00> : vector<512x128xf32>
    %4 = tpu.matmul %1, %3, %cst {dimension_numbers = #tpu.dot_dimension_numbers<[1], [0], [0], [1], [0, 0, 1, 1], [], []>} : vector<512x8xf32>, vector<8x128xf32>, vector<512x128xf32> -> vector<512x128xf32>
    %c0_5 = arith.constant 0 : index
    %c0_6 = arith.constant 0 : index
    %c0_7 = arith.constant 0 : index
    %5 = vector.load %arg4[%c0_5, %c0_6, %c0_7] : memref<1x1x128xf32, #tpu.memory_space<vmem>>, vector<1x1x128xf32>
    %6 = vector.shape_cast %5 : vector<1x1x128xf32> to vector<1x128xf32>
    %7 = vector.broadcast %6 : vector<1x128xf32> to vector<512x128xf32>
    %8 = arith.addf %4, %7 : vector<512x128xf32>
    %cst_8 = arith.constant 0.000000e+00 : f32
    %9 = vector.broadcast %cst_8 : f32 to vector<512x128xf32>
    %10 = arith.maximumf %8, %9 : vector<512x128xf32>
    %c0_9 = arith.constant 0 : index
    %c0_10 = arith.constant 0 : index
    %c0_11 = arith.constant 0 : index
    %11 = vector.load %arg7[%c0_9, %c0_10, %c0_11] : memref<1x512x128xf32, #tpu.memory_space<vmem>>, vector<1x512x128xf32>
    %12 = vector.shape_cast %11 : vector<1x512x128xf32> to vector<512x128xf32>
    %13 = vector.shape_cast %10 : vector<512x128xf32> to vector<1x512x128xf32>
    tpu.vector_store %arg7[%c0_9, %c0_10, %c0_11], %13 {strides = array<i32>} : memref<1x512x128xf32, #tpu.memory_space<vmem>>, vector<1x512x128xf32>,
    %c0_12 = arith.constant 0 : index
    %c0_13 = arith.constant 0 : index
    %c0_14 = arith.constant 0 : index
    %14 = vector.load %arg5[%c0_12, %c0_13, %c0_14] : memref<1x128x128xf32, #tpu.memory_space<vmem>>, vector<1x128x128xf32>
    %15 = vector.shape_cast %14 : vector<1x128x128xf32> to vector<128x128xf32>
    %cst_15 = arith.constant dense<0.000000e+00> : vector<512x128xf32>
    %16 = tpu.matmul %10, %15, %cst_15 {dimension_numbers = #tpu.dot_dimension_numbers<[1], [0], [0], [1], [0, 0, 1, 1], [], []>} : vector<512x128xf32>, vector<128x128xf32>, vector<512x128xf32> -> vector<512x128xf32>
    %c0_16 = arith.constant 0 : index
    %c0_17 = arith.constant 0 : index
    %c0_18 = arith.constant 0 : index
    %17 = vector.load %arg6[%c0_16, %c0_17, %c0_18] : memref<1x1x128xf32, #tpu.memory_space<vmem>>, vector<1x1x128xf32>
    %18 = vector.shape_cast %17 : vector<1x1x128xf32> to vector<1x128xf32>
    %19 = vector.broadcast %18 : vector<1x128xf32> to vector<512x128xf32>
    %20 = arith.addf %16, %19 : vector<512x128xf32>
    %cst_19 = arith.constant 0.000000e+00 : f32
    %21 = vector.broadcast %cst_19 : f32 to vector<512x128xf32>
    %22 = arith.maximumf %20, %21 : vector<512x128xf32>
    %c0_20 = arith.constant 0 : index
    %c0_21 = arith.constant 0 : index
    %c0_22 = arith.constant 0 : index
    %23 = vector.load %arg8[%c0_20, %c0_21, %c0_22] : memref<1x512x128xf32, #tpu.memory_space<vmem>>, vector<1x512x128xf32>
    %24 = vector.shape_cast %23 : vector<1x512x128xf32> to vector<512x128xf32>
    %25 = vector.shape_cast %22 : vector<512x128xf32> to vector<1x512x128xf32>
    tpu.vector_store %arg8[%c0_20, %c0_21, %c0_22], %25 {strides = array<i32>} : memref<1x512x128xf32, #tpu.memory_space<vmem>>, vector<1x512x128xf32>,
    return
  }
  func.func @transform_0(%arg0: i32, %arg1: i32) -> (i32, i32, i32) {
    %c0_i32 = arith.constant 0 : i32
    %c0_i32_0 = arith.constant 0 : i32
    return %arg0, %arg1, %c0_i32 : i32, i32, i32
  }
  func.func @transform_1(%arg0: i32, %arg1: i32) -> (i32, i32, i32) {
    %c0_i32 = arith.constant 0 : i32
    %c0_i32_0 = arith.constant 0 : i32
    %c0_i32_1 = arith.constant 0 : i32
    return %arg0, %c0_i32, %c0_i32_0 : i32, i32, i32
  }
  func.func @transform_2(%arg0: i32, %arg1: i32) -> (i32, i32, i32) {
    %c0_i32 = arith.constant 0 : i32
    %c0_i32_0 = arith.constant 0 : i32
    %c0_i32_1 = arith.constant 0 : i32
    return %arg0, %c0_i32, %c0_i32_0 : i32, i32, i32
  }
  func.func @transform_3(%arg0: i32, %arg1: i32) -> (i32, i32, i32) {
    %c0_i32 = arith.constant 0 : i32
    %c0_i32_0 = arith.constant 0 : i32
    %c0_i32_1 = arith.constant 0 : i32
    return %arg0, %c0_i32, %c0_i32_0 : i32, i32, i32
  }
  func.func @transform_4(%arg0: i32, %arg1: i32) -> (i32, i32, i32) {
    %c0_i32 = arith.constant 0 : i32
    %c0_i32_0 = arith.constant 0 : i32
    %c0_i32_1 = arith.constant 0 : i32
    return %arg0, %c0_i32, %c0_i32_0 : i32, i32, i32
  }
  func.func @transform_5(%arg0: i32, %arg1: i32) -> (i32, i32, i32) {
    %c0_i32 = arith.constant 0 : i32
    %c0_i32_0 = arith.constant 0 : i32
    return %arg0, %arg1, %c0_i32 : i32, i32, i32
  }
  func.func @transform_6(%arg0: i32, %arg1: i32) -> (i32, i32, i32) {
    %c0_i32 = arith.constant 0 : i32
    %c0_i32_0 = arith.constant 0 : i32
    return %arg0, %arg1, %c0_i32 : i32, i32, i32
  }
}

</mosaic_0001>

<bundles_post_ra>
// kernel: tpu_custom_call.1
= control target key start
LH: loop header
LB: loop body
LE: loop exit
PB: predicated region body
PF: predicated region fallthrough
CT: control target
= control target key end

     0   :  { %12 = vsyncpa [#allocation3], 0  ;;  %s3163_s0 = inlined_call_operand.vmem [shape: f32[3,512,8], index: 0, kind: input, shape index: {}]   ;;  %s3164_s1 = inlined_call_operand.vmem [shape: f32[3,8,128], index: 1, kind: input, shape index: {}]   ;;  %s3165_s2 = inlined_call_operand.vmem [shape: f32[3,1,128], index: 2, kind: input, shape index: {}]   ;;  %s3166_s3 = inlined_call_operand.vmem [shape: f32[3,128,128], index: 3, kind: input, shape index: {}]   ;;  %s3167_s4 = inlined_call_operand.vmem [shape: f32[3,1,128], index: 4, kind: input, shape index: {}]   ;;  %s3168_s5 = inlined_call_operand.hbm [shape: f32[3,512,128], index: 5, kind: output, shape index: {0}]   ;;  %s3169_s6 = inlined_call_operand.hbm [shape: f32[3,512,128], index: 6, kind: output, shape index: {1}]  }
   0x1   :  { %14 = vsyncpa [#allocation3 + $0x1], 0 }
   0x2   :  { %15 = vsyncpa [#allocation5], 0 }
   0x3   :  { %17 = vsyncpa [#allocation5 + $0x1], 0  ;;  %s2571_s21 = smov 0   ;;  %s2573_s22 = smov 0  }
   0x4   :  { %s2575_s23 = smov 0   ;;  %s2577_s24 = smov 0  }
   0x5   :  { %s2579_s25 = smov 0   ;;  %s2581_s26 = smov 0  }
   0x6 LB: > { %s1869_s27 = sadd.s32 4294967295, %s2530_s26   ;;  %s1870_s28 = sadd.s32 4294967294, %s2530_s26   ;;  %s2530_s26 = sphi %s2581_s26, %s23_s26   ;;  %s2526_s25 = sphi %s2579_s25, %s3178_s25   ;;  %s2522_s24 = sphi %s2577_s24, %s3177_s24   ;;  %s2518_s23 = sphi %s2575_s23, %s3176_s23   ;;  %s2514_s22 = sphi %s2573_s22, %s3175_s22   ;;  %s2510_s21 = sphi %s2571_s21, %s3174_s21  }
   0x7   : > { %s35_s29 = sadd.s32 1, %s2526_s25  ;;  %s176_s30 = sadd.s32 1, %s2518_s23 }
   0x8   : > { %p37_p0 = scmp.ge.s32.totalorder %s35_s29, 3  ;;  %p186_p1 = scmp.ne.s32.totalorder %s2518_s23, %s2514_s22 }
   0x9   : > { %p187_p2 = scmp.eq.s32.totalorder %s1869_s27, 2  ;;  %p192_p3 = scmp.ne.s32.totalorder %s2514_s22, %s2510_s21 }
   0xa   : > { %s3180_s29 = smov (%p37_p0, %s35_s29), 0  ;;  %p193_p5 = scmp.eq.s32.totalorder %s1870_s28, 2 }
   0xb   : > { %p2611_p4 = por %p187_p2, %p186_p1  ;;  %s171_s8 = ssub.s32 %s2526_s25, %s3180_s29 }
   0xc   : > { %p1873_p6 = scmp.ge.s32.totalorder %s2530_s26, 1  ;;  %p174_p7 = scmp.eq.s32.totalorder %s171_s8, 0 }
   0xd   : > { %p2618_p8 = por %p193_p5, %p192_p3  ;;  %p279_p9 = scmp.lt.s32.totalorder %s2530_s26, 4 }
   0xe   : > { %s2624_s10 = scalar_select %p174_p7, %s2518_s23, %s176_s30  }
   0xf   : > { %p280_p10 = pnand %p1873_p6, %p279_p9 }
  0x10   : > { %p334_p11 = scmp.lt.s32.totalorder (!%p280_p10), %s2522_s24, 2  ;;  %s2795_s14 = sand.u32 (!%p280_p10), 1, %s2514_s22  }
  0x11   : > { %283 = sbr.rel (%p280_p10) target bundleno = 571 (0x23b), region = 40  ;;  %s1874_s15 = sshll.u32 (!%p280_p10), %s2795_s14, 9 }
  0x16   : > { %s2628_s11 = scalar_select %p334_p11, %s2522_s24, 2  ;;  %vm432_vm0 = vcmask 64512  }
  0x18   : > { %s1955_s12 = sshll.u32 %s2628_s11, 9  ;;  %s1878_s13 = sshll.u32 %s2628_s11, 3 }
  0x19   : > { %s2635_s16 = scalar_lea.vmem %s3163_s0, %s1955_s12  ;;  %s346_s19 = scalar_lea.vmem %s3164_s1, %s1878_s13 }
  0x1a   : > { %v424_v0 = vld [vmem:[%s346_s19] sm:$0xff]  ;;  %v361_v2 = vld [vmem:[%s2635_s16 + $0x8] sm:$0xff]  ;;  %v362_v3 = vld [vmem:[%s2635_s16 + $0x10] sm:$0xff]  ;;  %s1956_s20 = sshll.u32 %s2628_s11, 7  ;;  %s349_s13 = scalar_lea.vmem %s3165_s2, %s2628_s11 }
  0x1b   : > { %v360_v1 = vld [vmem:[%s2635_s16] sm:$0xff]  ;;  %2104 = vmatprep.subr.mxu0 %v424_v0  ;;  %v363_v4 = vld [vmem:[%s2635_s16 + $0x18] sm:$0xff]  ;;  %v365_v6 = vld [vmem:[%s2635_s16 + $0x28] sm:$0xff]  ;;  %s2664_s30 = scalar_lea.vmem %s3166_s3, %s1956_s20  ;;  %s357_s19 = scalar_lea.vmem %s3167_s4, %s2628_s11 }
  0x1c   : > { %2106 = vmatprep.mubr.msk.f32.mxu0 %vm432_vm0, %v360_v1  ;;  %2105 = vmatpush3.msra.mxu0 %v424_v0  ;;  %v364_v5 = vld [vmem:[%s2635_s16 + $0x20] sm:$0xff]  ;;  %v366_v7 = vld [vmem:[%s2635_s16 + $0x30] sm:$0xff]  ;;  %v367_v8 = vld [vmem:[%s2635_s16 + $0x38] sm:$0xff]  ;;  %s3170_s20 = sshll.u32 %s2522_s24, 13  ;;  %s2953_s11 = scalar_lea.vmem [#allocation4], %s1874_s15 }
  0x1d   : > { %2107 = vmatmul.mubr.msk.f32.vlgmr.msra.gmra.mxu0 %vm432_vm0, %v361_v2  ;;  %v368_v9 = vld [vmem:[%s2635_s16 + $0x40] sm:$0xff]  ;;  %v369_v10 = vld [vmem:[%s2635_s16 + $0x48] sm:$0xff]  ;;  %v370_v11 = vld [vmem:[%s2635_s16 + $0x50] sm:$0xff]  ;;  %s2947_s8 = scalar_lea.hbm %s3168_s5, %s3170_s20  ;;  %s1675_s12 = scalar_lea.sflag [#allocation3], %s2795_s14 }
  0x1e   : > { %2109 = vmatprep.mubr.msk.f32.mxu0 %vm432_vm0, %v362_v3  ;;  %v371_v12 = vld [vmem:[%s2635_s16 + $0x58] sm:$0xff]  ;;  %v372_v13 = vld [vmem:[%s2635_s16 + $0x60] sm:$0xff]  ;;  %v1152_v15 = vld [vmem:[%s2664_s30 + $0x70] sm:$0xff] }
  0x1f   : > { %v1153_v14 = vld [vmem:[%s2664_s30 + $0x78] sm:$0xff]  ;;  %v373_v16 = vld [vmem:[%s2635_s16 + $0x68] sm:$0xff]  ;;  %v374_v18 = vld [vmem:[%s2635_s16 + $0x70] sm:$0xff] }
  0x20   : > { %2202 = vmatprep.subr.mxu0 %v1153_v14  ;;  %v1151_v17 = vld [vmem:[%s2664_s30 + $0x68] sm:$0xff]  ;;  %2330 = vmatprep.subr.mxu1 %v1153_v14  ;;  %v1150_v19 = vld [vmem:[%s2664_s30 + $0x60] sm:$0xff]  ;;  %v375_v20 = vld [vmem:[%s2635_s16 + $0x78] sm:$0xff] }
  0x21   : > { %2110 = vmatmul.mubr.msk.f32.gmra.mxu0 %vm432_vm0, %v363_v4  ;;  %2346 = vmatpush3.msra.mxu1 %v1153_v14  ;;  %v1149_v21 = vld [vmem:[%s2664_s30 + $0x58] sm:$0xff]  ;;  %v376_v22 = vld [vmem:[%s2635_s16 + $0x80] sm:$0xff]  ;;  %v1148_v23 = vld [vmem:[%s2664_s30 + $0x50] sm:$0xff] }
  0x22   : > { %2112 = vmatprep.mubr.msk.f32.mxu0 %vm432_vm0, %v364_v5  ;;  %2203 = vmatpush3.msra.mxu0 %v1153_v14  ;;  %v377_v24 = vld [vmem:[%s2635_s16 + $0x88] sm:$0xff]  ;;  %v378_v26 = vld [vmem:[%s2635_s16 + $0x90] sm:$0xff]  ;;  %v1146_v27 = vld [vmem:[%s2664_s30 + $0x40] sm:$0xff] }
  0x23   : > { %2204 = vmatprep.subr.mxu0 %v1152_v15  ;;  %2331 = vmatprep.subr.mxu1 %v1152_v15  ;;  %v1147_v25 = vld [vmem:[%s2664_s30 + $0x48] sm:$0xff]  ;;  %v379_v28 = vld [vmem:[%s2635_s16 + $0x98] sm:$0xff]  ;;  %v380_v30 = vld [vmem:[%s2635_s16 + $0xa0] sm:$0xff] }
  0x24   : > { %2205 = vmatpush3.msra.mxu0 %v1152_v15  ;;  %2347 = vmatpush3.msra.mxu1 %v1152_v15  ;;  %v1145_v29 = vld [vmem:[%s2664_s30 + $0x38] sm:$0xff]  ;;  %v1144_v31 = vld [vmem:[%s2664_s30 + $0x30] sm:$0xff]  ;;  %v381_v32 = vld [vmem:[%s2635_s16 + $0xa8] sm:$0xff] }
  0x25   : > { %2113 = vmatmul.mubr.msk.f32.gmra.mxu0 %vm432_vm0, %v365_v6  ;;  %2206 = vmatprep.subr.mxu0 %v1151_v17  ;;  %v1143_v33 = vld [vmem:[%s2664_s30 + $0x28] sm:$0xff]  ;;  %v382_v34 = vld [vmem:[%s2635_s16 + $0xb0] sm:$0xff]  ;;  %v1142_v35 = vld [vmem:[%s2664_s30 + $0x20] sm:$0xff] }
  0x26   : > { %2115 = vmatprep.mubr.msk.f32.mxu0 %vm432_vm0, %v366_v7  ;;  %2207 = vmatpush3.msra.mxu0 %v1151_v17  ;;  %v383_v36 = vld [vmem:[%s2635_s16 + $0xb8] sm:$0xff]  ;;  %v384_v37 = vld [vmem:[%s2635_s16 + $0xc0] sm:$0xff]  ;;  %v385_v38 = vld [vmem:[%s2635_s16 + $0xc8] sm:$0xff] }
  0x27   : > { %2208 = vmatprep.subr.mxu0 %v1150_v19  ;;  %2332 = vmatprep.subr.mxu1 %v1151_v17  ;;  %v386_v39 = vld [vmem:[%s2635_s16 + $0xd0] sm:$0xff]  ;;  %v387_v40 = vld [vmem:[%s2635_s16 + $0xd8] sm:$0xff]  ;;  %v388_v41 = vld [vmem:[%s2635_s16 + $0xe0] sm:$0xff] }
  0x28   : > { %2209 = vmatpush3.msra.mxu0 %v1150_v19  ;;  %2348 = vmatpush3.msra.mxu1 %v1151_v17  ;;  %v389_v42 = vld [vmem:[%s2635_s16 + $0xe8] sm:$0xff]  ;;  %v390_v43 = vld [vmem:[%s2635_s16 + $0xf0] sm:$0xff]  ;;  %v391_v44 = vld [vmem:[%s2635_s16 + $0xf8] sm:$0xff] }
  0x29   : > { %2116 = vmatmul.mubr.msk.f32.gmra.mxu0 %vm432_vm0, %v367_v8  ;;  %2210 = vmatprep.subr.mxu0 %v1149_v21  ;;  %v392_v45 = vld [vmem:[%s2635_s16 + $0x100] sm:$0xff]  ;;  %v393_v46 = vld [vmem:[%s2635_s16 + $0x108] sm:$0xff]  ;;  %v394_v47 = vld [vmem:[%s2635_s16 + $0x110] sm:$0xff] }
  0x2a   : > { %2118 = vmatprep.mubr.msk.f32.mxu0 %vm432_vm0, %v368_v9  ;;  %2211 = vmatpush3.msra.mxu0 %v1149_v21  ;;  %v1141_v48 = vld [vmem:[%s2664_s30 + $0x18] sm:$0xff]  ;;  %v1140_v50 = vld [vmem:[%s2664_s30 + $0x10] sm:$0xff]  ;;  %v396_v51 = vld [vmem:[%s2635_s16 + $0x120] sm:$0xff] }
  0x2b   : > { %2212 = vmatprep.subr.mxu0 %v1148_v23  ;;  %2333 = vmatprep.subr.mxu1 %v1150_v19  ;;  %v395_v49 = vld [vmem:[%s2635_s16 + $0x118] sm:$0xff]  ;;  %v1139_v52 = vld [vmem:[%s2664_s30 + $0x8] sm:$0xff]  ;;  %v1138_v54 = vld [vmem:[%s2664_s30] sm:$0xff] }
  0x2c   : > { %2213 = vmatpush3.msra.mxu0 %v1148_v23  ;;  %2349 = vmatpush3.msra.mxu1 %v1150_v19  ;;  %v397_v53 = vld [vmem:[%s2635_s16 + $0x128] sm:$0xff]  ;;  %v398_v55 = vld [vmem:[%s2635_s16 + $0x130] sm:$0xff]  ;;  %v399_v56 = vld [vmem:[%s2635_s16 + $0x138] sm:$0xff] }
  0x2d   : > { %2119 = vmatmul.mubr.msk.f32.gmra.mxu0 %vm432_vm0, %v369_v10  ;;  %2214 = vmatprep.subr.mxu0 %v1147_v25  ;;  %v400_v57 = vld [vmem:[%s2635_s16 + $0x140] sm:$0xff]  ;;  %v401_v58 = vld [vmem:[%s2635_s16 + $0x148] sm:$0xff]  ;;  %v402_v59 = vld [vmem:[%s2635_s16 + $0x150] sm:$0xff] }
  0x2e   : > { %2121 = vmatprep.mubr.msk.f32.mxu0 %vm432_vm0, %v370_v11  ;;  %2215 = vmatpush3.msra.mxu0 %v1147_v25  ;;  %v403_v60 = vld [vmem:[%s2635_s16 + $0x158] sm:$0xff]  ;;  %v404_v61 = vld [vmem:[%s2635_s16 + $0x160] sm:$0xff]  ;;  %v405_v62 = vld [vmem:[%s2635_s16 + $0x168] sm:$0xff] }
  0x2f   : > { %2216 = vmatprep.subr.mxu0 %v1146_v27  ;;  %2334 = vmatprep.subr.mxu1 %v1149_v21  ;;  %v406_v63 = vld [vmem:[%s2635_s16 + $0x170] sm:$0xff]  ;;  %v407_v0 = vld [vmem:[%s2635_s16 + $0x178] sm:$0xff]  ;;  %v408_v1 = vld [vmem:[%s2635_s16 + $0x180] sm:$0xff] }
  0x30   : > { %2217 = vmatpush3.msra.mxu0 %v1146_v27  ;;  %2350 = vmatpush3.msra.mxu1 %v1149_v21  ;;  %v409_v2 = vld [vmem:[%s2635_s16 + $0x188] sm:$0xff]  ;;  %v410_v3 = vld [vmem:[%s2635_s16 + $0x190] sm:$0xff]  ;;  %v411_v4 = vld [vmem:[%s2635_s16 + $0x198] sm:$0xff] }
  0x31   : > { %2122 = vmatmul.mubr.msk.f32.gmra.mxu0 %vm432_vm0, %v371_v12  ;;  %2218 = vmatprep.subr.mxu0 %v1145_v29  ;;  %v412_v5 = vld [vmem:[%s2635_s16 + $0x1a0] sm:$0xff]  ;;  %v413_v6 = vld [vmem:[%s2635_s16 + $0x1a8] sm:$0xff]  ;;  %v414_v7 = vld [vmem:[%s2635_s16 + $0x1b0] sm:$0xff] }
  0x32   : > { %2124 = vmatprep.mubr.msk.f32.mxu0 %vm432_vm0, %v372_v13  ;;  %2219 = vmatpush3.msra.mxu0 %v1145_v29  ;;  %v415_v8 = vld [vmem:[%s2635_s16 + $0x1b8] sm:$0xff]  ;;  %v416_v9 = vld [vmem:[%s2635_s16 + $0x1c0] sm:$0xff]  ;;  %v417_v10 = vld [vmem:[%s2635_s16 + $0x1c8] sm:$0xff] }
  0x33   : > { %2220 = vmatprep.subr.mxu0 %v1144_v31  ;;  %2335 = vmatprep.subr.mxu1 %v1148_v23  ;;  %v418_v11 = vld [vmem:[%s2635_s16 + $0x1d0] sm:$0xff]  ;;  %v419_v12 = vld [vmem:[%s2635_s16 + $0x1d8] sm:$0xff]  ;;  %v420_v13 = vld [vmem:[%s2635_s16 + $0x1e0] sm:$0xff] }
  0x34   : > { %2221 = vmatpush3.msra.mxu0 %v1144_v31  ;;  %2351 = vmatpush3.msra.mxu1 %v1148_v23  ;;  %v421_v14 = vld [vmem:[%s2635_s16 + $0x1e8] sm:$0xff]  ;;  %v422_v15 = vld [vmem:[%s2635_s16 + $0x1f0] sm:$0xff]  ;;  %v2797_v17 = vld [vmem:[%s349_s13] ss:$0 sm:$0xff] }
  0x35   : > { %2125 = vmatmul.mubr.msk.f32.gmra.mxu0 %vm432_vm0, %v373_v16  ;;  %2222 = vmatprep.subr.mxu0 %v1143_v33  ;;  %v423_v16 = vld [vmem:[%s2635_s16 + $0x1f8] sm:$0xff]  ;;  %s2804_s16 = scalar_lea.vmem [#allocation2], %s1874_s15 }
  0x36   : > { %2127 = vmatprep.mubr.msk.f32.mxu0 %vm432_vm0, %v374_v18  ;;  %2223 = vmatpush3.msra.mxu0 %v1143_v33  ;;  %s1695_s27 = sshll.u32 %s2804_s16, 4  ;;  %s2949_s27 = int_to_ptr.vmem [resolvable:$true] %s1695_s27 }
  0x37   : > { %2224 = vmatprep.subr.mxu0 %v1142_v35  ;;  %2336 = vmatprep.subr.mxu1 %v1147_v25  ;;  %s2424_s13 = scalar_lea.vmem %s2949_s27, 8192 }
  0x38   : > { %2225 = vmatpush3.msra.mxu0 %v1142_v35  ;;  %2352 = vmatpush3.msra.mxu1 %v1147_v25  ;;  %p2425_p12 = scmp.ne.s32.totalorder %s2949_s27, %s2424_s13 }
  0x39   : > { %2128 = vmatmul.mubr.msk.f32.gmra.mxu0 %vm432_vm0, %v375_v20  ;;  %2337 = vmatprep.subr.mxu1 %v1146_v27 }
  0x3a   : > { %2130 = vmatprep.mubr.msk.f32.mxu0 %vm432_vm0, %v376_v22  ;;  %2353 = vmatpush3.msra.mxu1 %v1146_v27  ;;  %p2426_p13 = pnand %p2425_p12, %p2611_p4 }
  0x3b   : > { %2338 = vmatprep.subr.mxu1 %v1145_v29  ;;  %2226 = vmatprep.subr.mxu0 %v1141_v48 }
  0x3c   : > { %2354 = vmatpush3.msra.mxu1 %v1145_v29  ;;  %2227 = vmatpush3.msra.mxu0 %v1141_v48  ;;  %p2427_p0 = pneg %p2426_p13 }
  0x3d   : > { %2131 = vmatmul.mubr.msk.f32.gmra.mxu0 %vm432_vm0, %v377_v24  ;;  %2339 = vmatprep.subr.mxu1 %v1144_v31 }
  0x3e   : > { %2133 = vmatprep.mubr.msk.f32.mxu0 %vm432_vm0, %v378_v26  ;;  %2355 = vmatpush3.msra.mxu1 %v1144_v31 }
  0x3f   : > { %2340 = vmatprep.subr.mxu1 %v1143_v33  ;;  %2228 = vmatprep.subr.mxu0 %v1140_v50 }
  0x40   : > { %2356 = vmatpush3.msra.mxu1 %v1143_v33  ;;  %2229 = vmatpush3.msra.mxu0 %v1140_v50 }
  0x41   : > { %2134 = vmatmul.mubr.msk.f32.gmra.mxu0 %vm432_vm0, %v379_v28  ;;  %2341 = vmatprep.subr.mxu1 %v1142_v35 }
  0x42   : > { %2136 = vmatprep.mubr.msk.f32.mxu0 %vm432_vm0, %v380_v30  ;;  %2357 = vmatpush3.msra.mxu1 %v1142_v35 }
  0x43   : > { %2342 = vmatprep.subr.mxu1 %v1141_v48  ;;  %2230 = vmatprep.subr.mxu0 %v1139_v52 }
  0x44   : > { %2358 = vmatpush3.msra.mxu1 %v1141_v48  ;;  %2231 = vmatpush3.msra.mxu0 %v1139_v52 }
  0x45   : > { %2137 = vmatmul.mubr.msk.f32.gmra.mxu0 %vm432_vm0, %v381_v32  ;;  %2232 = vmatprep.subr.mxu0 %v1138_v54 }
  0x46   : > { %2139 = vmatprep.mubr.msk.f32.mxu0 %vm432_vm0, %v382_v34  ;;  %2343 = vmatprep.subr.mxu1 %v1140_v50 }
  0x47   : > { %2233 = vmatpush3.msra.mxu0 %v1138_v54  ;;  %2359 = vmatpush3.msra.mxu1 %v1140_v50 }
  0x48   : > { %2344 = vmatprep.subr.mxu1 %v1139_v52 }
  0x49   : > { %2140 = vmatmul.mubr.msk.f32.gmra.mxu0 %vm432_vm0, %v383_v36  ;;  %2360 = vmatpush3.msra.mxu1 %v1139_v52 }
  0x4a   : > { %2142 = vmatprep.mubr.msk.f32.mxu0 %vm432_vm0, %v384_v37  ;;  %2345 = vmatprep.subr.mxu1 %v1138_v54 }
  0x4b   : > { %2361 = vmatpush3.msra.mxu1 %v1138_v54 }
  0x4d   : > { %2143 = vmatmul.mubr.msk.f32.gmra.mxu0 %vm432_vm0, %v385_v38 }
  0x4e   : > { %2145 = vmatprep.mubr.msk.f32.mxu0 %vm432_vm0, %v386_v39 }
  0x51   : > { %2146 = vmatmul.mubr.msk.f32.gmra.mxu0 %vm432_vm0, %v387_v40 }
  0x52   : > { %2148 = vmatprep.mubr.msk.f32.mxu0 %vm432_vm0, %v388_v41 }
  0x55   : > { %2149 = vmatmul.mubr.msk.f32.gmra.mxu0 %vm432_vm0, %v389_v42 }
  0x56   : > { %2151 = vmatprep.mubr.msk.f32.mxu0 %vm432_vm0, %v390_v43 }
  0x59   : > { %2152 = vmatmul.mubr.msk.f32.gmra.mxu0 %vm432_vm0, %v391_v44 }
  0x5a   : > { %2154 = vmatprep.mubr.msk.f32.mxu0 %vm432_vm0, %v392_v45 }
  0x5d   : > { %2155 = vmatmul.mubr.msk.f32.gmra.mxu0 %vm432_vm0, %v393_v46 }
  0x5e   : > { %2157 = vmatprep.mubr.msk.f32.mxu0 %vm432_vm0, %v394_v47 }
  0x61   : > { %2158 = vmatmul.mubr.msk.f32.gmra.mxu0 %vm432_vm0, %v395_v49 }
  0x62   : > { %2160 = vmatprep.mubr.msk.f32.mxu0 %vm432_vm0, %v396_v51 }
  0x65   : > { %2161 = vmatmul.mubr.msk.f32.gmra.mxu0 %vm432_vm0, %v397_v53 }
  0x66   : > { %2163 = vmatprep.mubr.msk.f32.mxu0 %vm432_vm0, %v398_v55 }
  0x69   : > { %2164 = vmatmul.mubr.msk.f32.gmra.mxu0 %vm432_vm0, %v399_v56 }
  0x6a   : > { %2166 = vmatprep.mubr.msk.f32.mxu0 %vm432_vm0, %v400_v57 }
  0x6d   : > { %2167 = vmatmul.mubr.msk.f32.gmra.mxu0 %vm432_vm0, %v401_v58 }
  0x6e   : > { %2169 = vmatprep.mubr.msk.f32.mxu0 %vm432_vm0, %v402_v59 }
  0x71   : > { %2170 = vmatmul.mubr.msk.f32.gmra.mxu0 %vm432_vm0, %v403_v60 }
  0x72   : > { %2172 = vmatprep.mubr.msk.f32.mxu0 %vm432_vm0, %v404_v61 }
  0x75   : > { %2173 = vmatmul.mubr.msk.f32.gmra.mxu0 %vm432_vm0, %v405_v62 }
  0x76   : > { %2175 = vmatprep.mubr.msk.f32.mxu0 %vm432_vm0, %v406_v63 }
  0x79   : > { %2176 = vmatmul.mubr.msk.f32.gmra.mxu0 %vm432_vm0, %v407_v0 }
  0x7a   : > { %2178 = vmatprep.mubr.msk.f32.mxu0 %vm432_vm0, %v408_v1 }
  0x7d   : > { %2179 = vmatmul.mubr.msk.f32.gmra.mxu0 %vm432_vm0, %v409_v2 }
  0x7e   : > { %2181 = vmatprep.mubr.msk.f32.mxu0 %vm432_vm0, %v410_v3 }
  0x81   : > { %2182 = vmatmul.mubr.msk.f32.gmra.mxu0 %vm432_vm0, %v411_v4 }
  0x82   : > { %2184 = vmatprep.mubr.msk.f32.mxu0 %vm432_vm0, %v412_v5 }
  0x85   : > { %2185 = vmatmul.mubr.msk.f32.gmra.mxu0 %vm432_vm0, %v413_v6 }
  0x86   : > { %2187 = vmatprep.mubr.msk.f32.mxu0 %vm432_vm0, %v414_v7 }
  0x89   : > { %2188 = vmatmul.mubr.msk.f32.gmra.mxu0 %vm432_vm0, %v415_v8 }
  0x8a   : > { %2190 = vmatprep.mubr.msk.f32.mxu0 %vm432_vm0, %v416_v9 }
  0x8d   : > { %2191 = vmatmul.mubr.msk.f32.gmra.mxu0 %vm432_vm0, %v417_v10 }
  0x8e   : > { %2193 = vmatprep.mubr.msk.f32.mxu0 %vm432_vm0, %v418_v11 }
  0x91   : > { %2194 = vmatmul.mubr.msk.f32.gmra.mxu0 %vm432_vm0, %v419_v12 }
  0x92   : > { %2196 = vmatprep.mubr.msk.f32.mxu0 %vm432_vm0, %v420_v13 }
  0x95   : > { %2197 = vmatmul.mubr.msk.f32.gmra.mxu0 %vm432_vm0, %v421_v14 }
  0x96   : > { %2199 = vmatprep.mubr.msk.f32.mxu0 %vm432_vm0, %v422_v15 }
  0x99   : > { %2200 = vmatmul.mubr.msk.f32.gmra.mxu0 %vm432_vm0, %v423_v16 }
  0xdd   : > { %v2108_v18 = vpop.f32.mrf.mxu0 }
  0xde   : > { %v697_v19 = vadd.f32 %v2108_v18, %v2797_v17 }
  0xdf   : > { %v691_v20 = vpop.f32.mrf.mxu0 }
  0xe0   : > { %v1011_v21 = vmax.f32 %v697_v19, 0.0  ;;  %v692_v22 = vadd.f32 %v2797_v17, %v691_v20 }
  0xe1   : > { %v2111_v23 = vpop.f32.mrf.mxu0 }
  0xe2   : > { %1075 = vst [vmem:[%s2804_s16 + $0x8] sm:$0xff] %v1011_v21  ;;  %v1010_v24 = vmax.f32 %v692_v22, 0.0  ;;  %v707_v25 = vadd.f32 %v2111_v23, %v2797_v17 }
  0xe3   : > { %v701_v26 = vpop.f32.mrf.mxu0 }
  0xe4   : > { %1074 = vst [vmem:[%s2804_s16] sm:$0xff] %v1010_v24  ;;  %v1013_v27 = vmax.f32 %v707_v25, 0.0  ;;  %v702_v28 = vadd.f32 %v2797_v17, %v701_v26  ;;  %2234 = vmatprep.mubr.f32.mxu0 %v1010_v24 }
  0xe5   : > { %v2114_v29 = vpop.f32.mrf.mxu0  ;;  %2235 = vmatmul.mubr.f32.vlgmr.msra.gmra.mxu0 %v1011_v21 }
  0xe6   : > { %1077 = vst [vmem:[%s2804_s16 + $0x18] sm:$0xff] %v1013_v27  ;;  %v1012_v30 = vmax.f32 %v702_v28, 0.0  ;;  %v717_v31 = vadd.f32 %v2114_v29, %v2797_v17 }
  0xe7   : > { %v711_v32 = vpop.f32.mrf.mxu0 }
  0xe8   : > { %1076 = vst [vmem:[%s2804_s16 + $0x10] sm:$0xff] %v1012_v30  ;;  %v1015_v33 = vmax.f32 %v717_v31, 0.0  ;;  %v712_v34 = vadd.f32 %v2797_v17, %v711_v32  ;;  %2237 = vmatprep.mubr.f32.mxu0 %v1012_v30 }
  0xe9   : > { %v2117_v35 = vpop.f32.mrf.mxu0  ;;  %2238 = vmatmul.mubr.f32.gmra.mxu0 %v1013_v27 }
  0xea   : > { %1079 = vst [vmem:[%s2804_s16 + $0x28] sm:$0xff] %v1015_v33  ;;  %v1014_v36 = vmax.f32 %v712_v34, 0.0  ;;  %v727_v37 = vadd.f32 %v2117_v35, %v2797_v17 }
  0xeb   : > { %v721_v38 = vpop.f32.mrf.mxu0 }
  0xec   : > { %1078 = vst [vmem:[%s2804_s16 + $0x20] sm:$0xff] %v1014_v36  ;;  %v1017_v39 = vmax.f32 %v727_v37, 0.0  ;;  %v722_v40 = vadd.f32 %v2797_v17, %v721_v38  ;;  %2240 = vmatprep.mubr.f32.mxu0 %v1014_v36 }
  0xed   : > { %v2120_v41 = vpop.f32.mrf.mxu0  ;;  %2241 = vmatmul.mubr.f32.gmra.mxu0 %v1015_v33 }
  0xee   : > { %1081 = vst [vmem:[%s2804_s16 + $0x38] sm:$0xff] %v1017_v39  ;;  %v1016_v42 = vmax.f32 %v722_v40, 0.0  ;;  %v737_v43 = vadd.f32 %v2120_v41, %v2797_v17 }
  0xef   : > { %v731_v44 = vpop.f32.mrf.mxu0 }
  0xf0   : > { %1080 = vst [vmem:[%s2804_s16 + $0x30] sm:$0xff] %v1016_v42  ;;  %v1019_v45 = vmax.f32 %v737_v43, 0.0  ;;  %v732_v46 = vadd.f32 %v2797_v17, %v731_v44  ;;  %2243 = vmatprep.mubr.f32.mxu1 %v1016_v42 }
  0xf1   : > { %v2123_v47 = vpop.f32.mrf.mxu0  ;;  %2244 = vmatmul.mubr.f32.vlgmr.msra.gmra.mxu1 %v1017_v39 }
  0xf2   : > { %1083 = vst [vmem:[%s2804_s16 + $0x48] sm:$0xff] %v1019_v45  ;;  %v1018_v48 = vmax.f32 %v732_v46, 0.0  ;;  %v747_v49 = vadd.f32 %v2123_v47, %v2797_v17 }
  0xf3   : > { %v741_v50 = vpop.f32.mrf.mxu0 }
  0xf4   : > { %1082 = vst [vmem:[%s2804_s16 + $0x40] sm:$0xff] %v1018_v48  ;;  %v1021_v51 = vmax.f32 %v747_v49, 0.0  ;;  %v742_v52 = vadd.f32 %v2797_v17, %v741_v50  ;;  %2246 = vmatprep.mubr.f32.mxu1 %v1018_v48 }
  0xf5   : > { %v2126_v53 = vpop.f32.mrf.mxu0  ;;  %2247 = vmatmul.mubr.f32.gmra.mxu1 %v1019_v45 }
  0xf6   : > { %1085 = vst [vmem:[%s2804_s16 + $0x58] sm:$0xff] %v1021_v51  ;;  %v1020_v54 = vmax.f32 %v742_v52, 0.0  ;;  %v757_v55 = vadd.f32 %v2126_v53, %v2797_v17 }
  0xf7   : > { %v751_v56 = vpop.f32.mrf.mxu0 }
  0xf8   : > { %1084 = vst [vmem:[%s2804_s16 + $0x50] sm:$0xff] %v1020_v54  ;;  %v1023_v57 = vmax.f32 %v757_v55, 0.0  ;;  %v752_v58 = vadd.f32 %v2797_v17, %v751_v56  ;;  %2249 = vmatprep.mubr.f32.mxu1 %v1020_v54 }
  0xf9   : > { %v2129_v59 = vpop.f32.mrf.mxu0  ;;  %2250 = vmatmul.mubr.f32.gmra.mxu1 %v1021_v51 }
  0xfa   : > { %1087 = vst [vmem:[%s2804_s16 + $0x68] sm:$0xff] %v1023_v57  ;;  %v1022_v60 = vmax.f32 %v752_v58, 0.0  ;;  %v767_v61 = vadd.f32 %v2129_v59, %v2797_v17 }
  0xfb   : > { %v761_v62 = vpop.f32.mrf.mxu0 }
  0xfc   : > { %1086 = vst [vmem:[%s2804_s16 + $0x60] sm:$0xff] %v1022_v60  ;;  %v1025_v63 = vmax.f32 %v767_v61, 0.0  ;;  %v762_v0 = vadd.f32 %v2797_v17, %v761_v62  ;;  %2252 = vmatprep.mubr.f32.mxu1 %v1022_v60 }
  0xfd   : > { %v2132_v1 = vpop.f32.mrf.mxu0  ;;  %2253 = vmatmul.mubr.f32.gmra.mxu1 %v1023_v57 }
  0xfe   : > { %1089 = vst [vmem:[%s2804_s16 + $0x78] sm:$0xff] %v1025_v63  ;;  %v1024_v2 = vmax.f32 %v762_v0, 0.0  ;;  %v777_v3 = vadd.f32 %v2132_v1, %v2797_v17 }
  0xff   : > { %v771_v4 = vpop.f32.mrf.mxu0 }
 0x100   : > { %1088 = vst [vmem:[%s2804_s16 + $0x70] sm:$0xff] %v1024_v2  ;;  %v1027_v5 = vmax.f32 %v777_v3, 0.0  ;;  %v772_v6 = vadd.f32 %v2797_v17, %v771_v4  ;;  %2255 = vmatprep.mubr.f32.mxu1 %v1024_v2 }
 0x101   : > { %v2135_v7 = vpop.f32.mrf.mxu0  ;;  %2256 = vmatmul.mubr.f32.gmra.mxu1 %v1025_v63 }
 0x102   : > { %1091 = vst [vmem:[%s2804_s16 + $0x88] sm:$0xff] %v1027_v5  ;;  %v1026_v8 = vmax.f32 %v772_v6, 0.0  ;;  %v787_v9 = vadd.f32 %v2135_v7, %v2797_v17 }
 0x103   : > { %v781_v10 = vpop.f32.mrf.mxu0 }
 0x104   : > { %1090 = vst [vmem:[%s2804_s16 + $0x80] sm:$0xff] %v1026_v8  ;;  %v1029_v11 = vmax.f32 %v787_v9, 0.0  ;;  %v782_v12 = vadd.f32 %v2797_v17, %v781_v10  ;;  %2258 = vmatprep.mubr.f32.mxu1 %v1026_v8 }
 0x105   : > { %v2138_v13 = vpop.f32.mrf.mxu0  ;;  %2259 = vmatmul.mubr.f32.gmra.mxu1 %v1027_v5 }
 0x106   : > { %1093 = vst [vmem:[%s2804_s16 + $0x98] sm:$0xff] %v1029_v11  ;;  %v1028_v14 = vmax.f32 %v782_v12, 0.0  ;;  %v797_v15 = vadd.f32 %v2138_v13, %v2797_v17 }
 0x107   : > { %v791_v16 = vpop.f32.mrf.mxu0 }
 0x108   : > { %1092 = vst [vmem:[%s2804_s16 + $0x90] sm:$0xff] %v1028_v14  ;;  %v1031_v18 = vmax.f32 %v797_v15, 0.0  ;;  %v792_v19 = vadd.f32 %v2797_v17, %v791_v16  ;;  %2261 = vmatprep.mubr.f32.mxu1 %v1028_v14 }
 0x109   : > { %v2141_v20 = vpop.f32.mrf.mxu0  ;;  %2262 = vmatmul.mubr.f32.gmra.mxu1 %v1029_v11 }
 0x10a   : > { %1095 = vst [vmem:[%s2804_s16 + $0xa8] sm:$0xff] %v1031_v18  ;;  %v1030_v21 = vmax.f32 %v792_v19, 0.0  ;;  %v807_v22 = vadd.f32 %v2141_v20, %v2797_v17 }
 0x10b   : > { %v801_v23 = vpop.f32.mrf.mxu0 }
 0x10c   : > { %1094 = vst [vmem:[%s2804_s16 + $0xa0] sm:$0xff] %v1030_v21  ;;  %v1033_v24 = vmax.f32 %v807_v22, 0.0  ;;  %v802_v25 = vadd.f32 %v2797_v17, %v801_v23  ;;  %2264 = vmatprep.mubr.f32.mxu1 %v1030_v21 }
 0x10d   : > { %v2144_v26 = vpop.f32.mrf.mxu0  ;;  %2265 = vmatmul.mubr.f32.gmra.mxu1 %v1031_v18 }
 0x10e   : > { %1097 = vst [vmem:[%s2804_s16 + $0xb8] sm:$0xff] %v1033_v24  ;;  %v1032_v27 = vmax.f32 %v802_v25, 0.0  ;;  %v817_v28 = vadd.f32 %v2144_v26, %v2797_v17 }
 0x10f   : > { %v811_v29 = vpop.f32.mrf.mxu0 }
 0x110   : > { %1096 = vst [vmem:[%s2804_s16 + $0xb0] sm:$0xff] %v1032_v27  ;;  %v1035_v30 = vmax.f32 %v817_v28, 0.0  ;;  %v812_v31 = vadd.f32 %v2797_v17, %v811_v29  ;;  %2267 = vmatprep.mubr.f32.mxu1 %v1032_v27 }
 0x111   : > { %v2147_v32 = vpop.f32.mrf.mxu0  ;;  %2268 = vmatmul.mubr.f32.gmra.mxu1 %v1033_v24 }
 0x112   : > { %1099 = vst [vmem:[%s2804_s16 + $0xc8] sm:$0xff] %v1035_v30  ;;  %v1034_v33 = vmax.f32 %v812_v31, 0.0  ;;  %v827_v34 = vadd.f32 %v2147_v32, %v2797_v17 }
 0x113   : > { %v821_v35 = vpop.f32.mrf.mxu0 }
 0x114   : > { %1098 = vst [vmem:[%s2804_s16 + $0xc0] sm:$0xff] %v1034_v33  ;;  %v1037_v36 = vmax.f32 %v827_v34, 0.0  ;;  %v822_v37 = vadd.f32 %v2797_v17, %v821_v35  ;;  %2270 = vmatprep.mubr.f32.mxu1 %v1034_v33 }
 0x115   : > { %v2150_v38 = vpop.f32.mrf.mxu0  ;;  %2271 = vmatmul.mubr.f32.gmra.mxu1 %v1035_v30 }
 0x116   : > { %1101 = vst [vmem:[%s2804_s16 + $0xd8] sm:$0xff] %v1037_v36  ;;  %v1036_v39 = vmax.f32 %v822_v37, 0.0  ;;  %v837_v40 = vadd.f32 %v2150_v38, %v2797_v17 }
 0x117   : > { %v831_v41 = vpop.f32.mrf.mxu0 }
 0x118   : > { %1100 = vst [vmem:[%s2804_s16 + $0xd0] sm:$0xff] %v1036_v39  ;;  %v1039_v42 = vmax.f32 %v837_v40, 0.0  ;;  %v832_v43 = vadd.f32 %v2797_v17, %v831_v41  ;;  %2273 = vmatprep.mubr.f32.mxu1 %v1036_v39 }
 0x119   : > { %v2153_v44 = vpop.f32.mrf.mxu0  ;;  %2274 = vmatmul.mubr.f32.gmra.mxu1 %v1037_v36 }
 0x11a   : > { %1103 = vst [vmem:[%s2804_s16 + $0xe8] sm:$0xff] %v1039_v42  ;;  %v1038_v45 = vmax.f32 %v832_v43, 0.0  ;;  %v847_v46 = vadd.f32 %v2153_v44, %v2797_v17 }
 0x11b   : > { %v841_v47 = vpop.f32.mrf.mxu0 }
 0x11c   : > { %1102 = vst [vmem:[%s2804_s16 + $0xe0] sm:$0xff] %v1038_v45  ;;  %v1041_v48 = vmax.f32 %v847_v46, 0.0  ;;  %v842_v49 = vadd.f32 %v2797_v17, %v841_v47  ;;  %2276 = vmatprep.mubr.f32.mxu1 %v1038_v45 }
 0x11d   : > { %v2156_v50 = vpop.f32.mrf.mxu0  ;;  %2277 = vmatmul.mubr.f32.gmra.mxu1 %v1039_v42 }
 0x11e   : > { %1105 = vst [vmem:[%s2804_s16 + $0xf8] sm:$0xff] %v1041_v48  ;;  %v1040_v51 = vmax.f32 %v842_v49, 0.0  ;;  %v857_v52 = vadd.f32 %v2156_v50, %v2797_v17 }
 0x11f   : > { %v851_v53 = vpop.f32.mrf.mxu0 }
 0x120   : > { %1104 = vst [vmem:[%s2804_s16 + $0xf0] sm:$0xff] %v1040_v51  ;;  %v1043_v54 = vmax.f32 %v857_v52, 0.0  ;;  %v852_v55 = vadd.f32 %v2797_v17, %v851_v53  ;;  %2279 = vmatprep.mubr.f32.mxu1 %v1040_v51 }
 0x121   : > { %v2159_v56 = vpop.f32.mrf.mxu0  ;;  %2280 = vmatmul.mubr.f32.gmra.mxu1 %v1041_v48 }
 0x122   : > { %1107 = vst [vmem:[%s2804_s16 + $0x108] sm:$0xff] %v1043_v54  ;;  %v1042_v57 = vmax.f32 %v852_v55, 0.0  ;;  %v867_v58 = vadd.f32 %v2159_v56, %v2797_v17 }
 0x123   : > { %v861_v59 = vpop.f32.mrf.mxu0 }
 0x124   : > { %1106 = vst [vmem:[%s2804_s16 + $0x100] sm:$0xff] %v1042_v57  ;;  %v1045_v60 = vmax.f32 %v867_v58, 0.0  ;;  %v862_v61 = vadd.f32 %v2797_v17, %v861_v59  ;;  %2282 = vmatprep.mubr.f32.mxu1 %v1042_v57 }
 0x125   : > { %v2162_v62 = vpop.f32.mrf.mxu0  ;;  %2283 = vmatmul.mubr.f32.gmra.mxu1 %v1043_v54 }
 0x126   : > { %1109 = vst [vmem:[%s2804_s16 + $0x118] sm:$0xff] %v1045_v60  ;;  %v1044_v63 = vmax.f32 %v862_v61, 0.0  ;;  %v877_v0 = vadd.f32 %v2162_v62, %v2797_v17 }
 0x127   : > { %v871_v1 = vpop.f32.mrf.mxu0 }
 0x128   : > { %1108 = vst [vmem:[%s2804_s16 + $0x110] sm:$0xff] %v1044_v63  ;;  %v1047_v2 = vmax.f32 %v877_v0, 0.0  ;;  %v872_v3 = vadd.f32 %v2797_v17, %v871_v1  ;;  %2285 = vmatprep.mubr.f32.mxu1 %v1044_v63 }
 0x129   : > { %v2165_v4 = vpop.f32.mrf.mxu0  ;;  %2286 = vmatmul.mubr.f32.gmra.mxu1 %v1045_v60 }
 0x12a   : > { %1111 = vst [vmem:[%s2804_s16 + $0x128] sm:$0xff] %v1047_v2  ;;  %v1046_v5 = vmax.f32 %v872_v3, 0.0  ;;  %v887_v6 = vadd.f32 %v2165_v4, %v2797_v17 }
 0x12b   : > { %v881_v7 = vpop.f32.mrf.mxu0 }
 0x12c   : > { %1110 = vst [vmem:[%s2804_s16 + $0x120] sm:$0xff] %v1046_v5  ;;  %v1049_v8 = vmax.f32 %v887_v6, 0.0  ;;  %v882_v9 = vadd.f32 %v2797_v17, %v881_v7  ;;  %2288 = vmatprep.mubr.f32.mxu1 %v1046_v5 }
 0x12d   : > { %v2168_v10 = vpop.f32.mrf.mxu0  ;;  %2289 = vmatmul.mubr.f32.gmra.mxu1 %v1047_v2 }
 0x12e   : > { %1113 = vst [vmem:[%s2804_s16 + $0x138] sm:$0xff] %v1049_v8  ;;  %v1048_v11 = vmax.f32 %v882_v9, 0.0  ;;  %v897_v12 = vadd.f32 %v2168_v10, %v2797_v17 }
 0x12f   : > { %v891_v13 = vpop.f32.mrf.mxu0 }
 0x130   : > { %1112 = vst [vmem:[%s2804_s16 + $0x130] sm:$0xff] %v1048_v11  ;;  %v1051_v14 = vmax.f32 %v897_v12, 0.0  ;;  %v892_v15 = vadd.f32 %v2797_v17, %v891_v13  ;;  %2291 = vmatprep.mubr.f32.mxu1 %v1048_v11 }
 0x131   : > { %v2171_v16 = vpop.f32.mrf.mxu0  ;;  %2292 = vmatmul.mubr.f32.gmra.mxu1 %v1049_v8 }
 0x132   : > { %1115 = vst [vmem:[%s2804_s16 + $0x148] sm:$0xff] %v1051_v14  ;;  %v1050_v18 = vmax.f32 %v892_v15, 0.0  ;;  %v907_v19 = vadd.f32 %v2171_v16, %v2797_v17 }
 0x133   : > { %v901_v20 = vpop.f32.mrf.mxu0 }
 0x134   : > { %1114 = vst [vmem:[%s2804_s16 + $0x140] sm:$0xff] %v1050_v18  ;;  %v1053_v21 = vmax.f32 %v907_v19, 0.0  ;;  %v902_v22 = vadd.f32 %v2797_v17, %v901_v20  ;;  %2294 = vmatprep.mubr.f32.mxu1 %v1050_v18 }
 0x135   : > { %v2174_v23 = vpop.f32.mrf.mxu0  ;;  %2295 = vmatmul.mubr.f32.gmra.mxu1 %v1051_v14 }
 0x136   : > { %1117 = vst [vmem:[%s2804_s16 + $0x158] sm:$0xff] %v1053_v21  ;;  %v1052_v24 = vmax.f32 %v902_v22, 0.0  ;;  %v917_v25 = vadd.f32 %v2174_v23, %v2797_v17 }
 0x137   : > { %v911_v26 = vpop.f32.mrf.mxu0 }
 0x138   : > { %1116 = vst [vmem:[%s2804_s16 + $0x150] sm:$0xff] %v1052_v24  ;;  %v1055_v27 = vmax.f32 %v917_v25, 0.0  ;;  %v912_v28 = vadd.f32 %v2797_v17, %v911_v26  ;;  %2297 = vmatprep.mubr.f32.mxu1 %v1052_v24 }
 0x139   : > { %v2177_v29 = vpop.f32.mrf.mxu0  ;;  %2298 = vmatmul.mubr.f32.gmra.mxu1 %v1053_v21  ;;  %v2936_v21 = vld [vmem:[%s357_s19] ss:$0 sm:$0xff] }
 0x13a   : > { %1119 = vst [vmem:[%s2804_s16 + $0x168] sm:$0xff] %v1055_v27  ;;  %v1054_v30 = vmax.f32 %v912_v28, 0.0  ;;  %v927_v31 = vadd.f32 %v2177_v29, %v2797_v17 }
 0x13b   : > { %v921_v32 = vpop.f32.mrf.mxu0 }
 0x13c   : > { %1118 = vst [vmem:[%s2804_s16 + $0x160] sm:$0xff] %v1054_v30  ;;  %v1057_v33 = vmax.f32 %v927_v31, 0.0  ;;  %v922_v34 = vadd.f32 %v2797_v17, %v921_v32  ;;  %2300 = vmatprep.mubr.f32.mxu1 %v1054_v30 }
 0x13d   : > { %v2180_v35 = vpop.f32.mrf.mxu0  ;;  %2301 = vmatmul.mubr.f32.gmra.mxu1 %v1055_v27 }
 0x13e   : > { %1121 = vst [vmem:[%s2804_s16 + $0x178] sm:$0xff] %v1057_v33  ;;  %v1056_v36 = vmax.f32 %v922_v34, 0.0  ;;  %v937_v37 = vadd.f32 %v2180_v35, %v2797_v17 }
 0x13f   : > { %v931_v38 = vpop.f32.mrf.mxu0 }
 0x140   : > { %1120 = vst [vmem:[%s2804_s16 + $0x170] sm:$0xff] %v1056_v36  ;;  %v1059_v39 = vmax.f32 %v937_v37, 0.0  ;;  %v932_v40 = vadd.f32 %v2797_v17, %v931_v38  ;;  %2303 = vmatprep.mubr.f32.mxu1 %v1056_v36 }
 0x141   : > { %v2183_v41 = vpop.f32.mrf.mxu0  ;;  %2304 = vmatmul.mubr.f32.gmra.mxu1 %v1057_v33 }
 0x142   : > { %1123 = vst [vmem:[%s2804_s16 + $0x188] sm:$0xff] %v1059_v39  ;;  %v1058_v42 = vmax.f32 %v932_v40, 0.0  ;;  %v947_v43 = vadd.f32 %v2183_v41, %v2797_v17 }
 0x143   : > { %v941_v44 = vpop.f32.mrf.mxu0 }
 0x144   : > { %1122 = vst [vmem:[%s2804_s16 + $0x180] sm:$0xff] %v1058_v42  ;;  %v1061_v45 = vmax.f32 %v947_v43, 0.0  ;;  %v942_v46 = vadd.f32 %v2797_v17, %v941_v44  ;;  %2306 = vmatprep.mubr.f32.mxu1 %v1058_v42 }
 0x145   : > { %v2186_v47 = vpop.f32.mrf.mxu0  ;;  %2307 = vmatmul.mubr.f32.gmra.mxu1 %v1059_v39 }
 0x146   : > { %1125 = vst [vmem:[%s2804_s16 + $0x198] sm:$0xff] %v1061_v45  ;;  %v1060_v48 = vmax.f32 %v942_v46, 0.0  ;;  %v957_v49 = vadd.f32 %v2186_v47, %v2797_v17 }
 0x147   : > { %v951_v50 = vpop.f32.mrf.mxu0 }
 0x148   : > { %1124 = vst [vmem:[%s2804_s16 + $0x190] sm:$0xff] %v1060_v48  ;;  %v1063_v51 = vmax.f32 %v957_v49, 0.0  ;;  %v952_v52 = vadd.f32 %v2797_v17, %v951_v50  ;;  %2309 = vmatprep.mubr.f32.mxu1 %v1060_v48 }
 0x149   : > { %v2189_v53 = vpop.f32.mrf.mxu0  ;;  %2310 = vmatmul.mubr.f32.gmra.mxu1 %v1061_v45 }
 0x14a   : > { %1127 = vst [vmem:[%s2804_s16 + $0x1a8] sm:$0xff] %v1063_v51  ;;  %v1062_v54 = vmax.f32 %v952_v52, 0.0  ;;  %v967_v55 = vadd.f32 %v2189_v53, %v2797_v17 }
 0x14b   : > { %v961_v56 = vpop.f32.mrf.mxu0 }
 0x14c   : > { %1126 = vst [vmem:[%s2804_s16 + $0x1a0] sm:$0xff] %v1062_v54  ;;  %v1065_v57 = vmax.f32 %v967_v55, 0.0  ;;  %v962_v58 = vadd.f32 %v2797_v17, %v961_v56  ;;  %2312 = vmatprep.mubr.f32.mxu1 %v1062_v54 }
 0x14d   : > { %v2192_v59 = vpop.f32.mrf.mxu0  ;;  %2313 = vmatmul.mubr.f32.gmra.mxu1 %v1063_v51 }
 0x14e   : > { %1129 = vst [vmem:[%s2804_s16 + $0x1b8] sm:$0xff] %v1065_v57  ;;  %v1064_v60 = vmax.f32 %v962_v58, 0.0  ;;  %v977_v61 = vadd.f32 %v2192_v59, %v2797_v17 }
 0x14f   : > { %v971_v62 = vpop.f32.mrf.mxu0 }
 0x150   : > { %1128 = vst [vmem:[%s2804_s16 + $0x1b0] sm:$0xff] %v1064_v60  ;;  %v1067_v63 = vmax.f32 %v977_v61, 0.0  ;;  %v972_v0 = vadd.f32 %v2797_v17, %v971_v62  ;;  %2315 = vmatprep.mubr.f32.mxu1 %v1064_v60 }
 0x151   : > { %v2195_v1 = vpop.f32.mrf.mxu0  ;;  %2316 = vmatmul.mubr.f32.gmra.mxu1 %v1065_v57 }
 0x152   : > { %1131 = vst [vmem:[%s2804_s16 + $0x1c8] sm:$0xff] %v1067_v63  ;;  %v1066_v2 = vmax.f32 %v972_v0, 0.0  ;;  %v987_v3 = vadd.f32 %v2195_v1, %v2797_v17 }
 0x153   : > { %v981_v4 = vpop.f32.mrf.mxu0 }
 0x154   : > { %1130 = vst [vmem:[%s2804_s16 + $0x1c0] sm:$0xff] %v1066_v2  ;;  %v1069_v5 = vmax.f32 %v987_v3, 0.0  ;;  %v982_v6 = vadd.f32 %v2797_v17, %v981_v4  ;;  %2318 = vmatprep.mubr.f32.mxu1 %v1066_v2 }
 0x155   : > { %v2198_v7 = vpop.f32.mrf.mxu0  ;;  %2319 = vmatmul.mubr.f32.gmra.mxu1 %v1067_v63 }
 0x156   : > { %1133 = vst [vmem:[%s2804_s16 + $0x1d8] sm:$0xff] %v1069_v5  ;;  %v1068_v8 = vmax.f32 %v982_v6, 0.0  ;;  %v997_v9 = vadd.f32 %v2198_v7, %v2797_v17 }
 0x157   : > { %v991_v10 = vpop.f32.mrf.mxu0 }
 0x158   : > { %1132 = vst [vmem:[%s2804_s16 + $0x1d0] sm:$0xff] %v1068_v8  ;;  %v1071_v11 = vmax.f32 %v997_v9, 0.0  ;;  %v992_v12 = vadd.f32 %v2797_v17, %v991_v10  ;;  %2321 = vmatprep.mubr.f32.mxu1 %v1068_v8 }
 0x159   : > { %v2201_v13 = vpop.f32.mrf.mxu0  ;;  %2322 = vmatmul.mubr.f32.gmra.mxu1 %v1069_v5 }
 0x15a   : > { %1135 = vst [vmem:[%s2804_s16 + $0x1e8] sm:$0xff] %v1071_v11  ;;  %v1070_v14 = vmax.f32 %v992_v12, 0.0  ;;  %v1007_v15 = vadd.f32 %v2201_v13, %v2797_v17 }
 0x15b   : > { %v1001_v16 = vpop.f32.mrf.mxu0 }
 0x15c   : > { %1134 = vst [vmem:[%s2804_s16 + $0x1e0] sm:$0xff] %v1070_v14  ;;  %v1073_v18 = vmax.f32 %v1007_v15, 0.0  ;;  %v1002_v19 = vadd.f32 %v2797_v17, %v1001_v16  ;;  %2324 = vmatprep.mubr.f32.mxu1 %v1070_v14 }
 0x15d   : > { %2325 = vmatmul.mubr.f32.gmra.mxu1 %v1071_v11 }
 0x15e   : > { %1137 = vst [vmem:[%s2804_s16 + $0x1f8] sm:$0xff] %v1073_v18  ;;  %v1072_v20 = vmax.f32 %v1002_v19, 0.0 }
 0x160   : > { %1136 = vst [vmem:[%s2804_s16 + $0x1f0] sm:$0xff] %v1072_v20  ;;  %2327 = vmatprep.mubr.f32.mxu1 %v1072_v20  ;;  %s2532_s16 = smov [#allocation2]  }
 0x161   : > { %2328 = vmatmul.mubr.f32.gmra.mxu1 %v1073_v18  ;;  %s2428_s17 = sshll.u32 %s2532_s16, 4  ;;  %s2429_s17 = int_to_ptr.vmem [resolvable:$false] %s2428_s17 }
 0x162   : > { %s2430_s18 = scalar_lea.vmem %s2429_s17, 16384  ;;  %p2431_p1 = scmp.lt.s32.totalorder %s2949_s27, %s2429_s17 }
 0x163   : > { %p2432_p2 = scmp.lt.s32.totalorder %s2430_s18, %s2424_s13 }
 0x165   : > { %p2433_p3 = por %p2432_p2, %p2431_p1 }
 0x167   : > { %p2434_p5 = pnand %p2433_p3, %p2427_p0 }
 0x1a5   : > { %v2236_v22 = vpop.f32.mrf.mxu0 }
 0x1a6   : > { %v1233_v23 = vadd.f32 %v2236_v22, %v2936_v21 }
 0x1a7   : > { %v1227_v17 = vpop.f32.mrf.mxu0 }
 0x1a8   : > { %v1547_v24 = vmax.f32 %v1233_v23, 0.0  ;;  %v1228_v25 = vadd.f32 %v2936_v21, %v1227_v17 }
 0x1a9   : > { %v2239_v26 = vpop.f32.mrf.mxu0 }
 0x1aa   : > { %1611 = vst [vmem:[%s2953_s11 + $0x8] sm:$0xff] %v1547_v24  ;;  %v1546_v27 = vmax.f32 %v1228_v25, 0.0  ;;  %v1243_v28 = vadd.f32 %v2239_v26, %v2936_v21 }
 0x1ab   : > { %v1237_v29 = vpop.f32.mrf.mxu0 }
 0x1ac   : > { %2437 = shalt.err (!%p2434_p5)
}
 0x1ad   : > { %s2438_s15 = scalar_lea.hbm %s2947_s8, 8192  ;;  %s2442_s30 = scalar_lea.hbm %s3168_s5, 24576 }
 0x1ae   : > { %p2439_p6 = scmp.ne.s32.totalorder %s2947_s8, %s2438_s15  ;;  %p2443_p10 = scmp.lt.s32.totalorder %s2947_s8, %s3168_s5 }
 0x1af   : > { %p2444_p11 = scmp.lt.s32.totalorder %s2442_s30, %s2438_s15 }
 0x1b0   : > { %p2440_p7 = pnand %p2439_p6, %p2611_p4 }
 0x1b1   : > { %p2445_p12 = por %p2444_p11, %p2443_p10 }
 0x1b2   : > { %p2441_p9 = pneg %p2440_p7 }
 0x1b4   : > { %p2446_p13 = pnand %p2445_p12, %p2441_p9 }
 0x1b6   : > { %2449 = shalt.err (!%p2446_p13)
}
 0x1b7   : > { %s2533_s13 = smov 128   ;;  %s2534_s17 = smov 8   ;;  %1610 = vst [vmem:[%s2953_s11] sm:$0xff] %v1546_v27  ;;  %v1549_v30 = vmax.f32 %v1243_v28, 0.0  ;;  %v1238_v31 = vadd.f32 %v2936_v21, %v1237_v29  ;;  %v2242_v32 = vpop.f32.mrf.mxu0  ;;  %v2245_v38 = vpop.f32.mrf.mxu1 }
 0x1b8   : > { %2362 = dma.vmem_to_hbm [thread:$0]  (%p2611_p4), %s2949_s27, 8192, %s2947_s8, %s1675_s12, %s2533_s13, %s2533_s13, %s2534_s17   ;;  %v1253_v34 = vadd.f32 %v2242_v32, %v2936_v21  ;;  %v1263_v40 = vadd.f32 %v2245_v38, %v2936_v21 }
 0x1b9   : > { %1613 = vst [vmem:[%s2953_s11 + $0x18] sm:$0xff] %v1549_v30  ;;  %v1548_v33 = vmax.f32 %v1238_v31, 0.0  ;;  %v1247_v35 = vpop.f32.mrf.mxu0  ;;  %v1257_v41 = vpop.f32.mrf.mxu1  ;;  %s1713_s20 = sshll.u32 %s2953_s11, 4  ;;  %s3173_s27 = sshll.u32 %s2522_s24, 13  ;;  %s3114_s20 = int_to_ptr.vmem [resolvable:$true] %s1713_s20 }
 0x1ba   : > { %v1551_v36 = vmax.f32 %v1253_v34, 0.0  ;;  %v1248_v37 = vadd.f32 %v2936_v21, %v1247_v35  ;;  %v1553_v42 = vmax.f32 %v1263_v40, 0.0  ;;  %v1258_v43 = vadd.f32 %v2936_v21, %v1257_v41  ;;  %s3112_s18 = scalar_lea.hbm %s3169_s6, %s3173_s27  ;;  %s1680_s15 = scalar_lea.sflag [#allocation5], %s2795_s14 }
 0x1bb   : > { %1612 = vst [vmem:[%s2953_s11 + $0x10] sm:$0xff] %v1548_v33  ;;  %v2248_v44 = vpop.f32.mrf.mxu1  ;;  %s2450_s19 = scalar_lea.vmem %s3114_s20, 8192  ;;  %s2535_s28 = smov [#allocation4]  }
 0x1bc   : > { %1615 = vst [vmem:[%s2953_s11 + $0x28] sm:$0xff] %v1551_v36  ;;  %v1550_v39 = vmax.f32 %v1248_v37, 0.0  ;;  %1617 = vst [vmem:[%s2953_s11 + $0x38] sm:$0xff] %v1553_v42  ;;  %v1552_v45 = vmax.f32 %v1258_v43, 0.0  ;;  %v1273_v46 = vadd.f32 %v2248_v44, %v2936_v21  ;;  %p2451_p0 = scmp.ne.s32.totalorder %s3114_s20, %s2450_s19  ;;  %s2454_s30 = sshll.u32 %s2535_s28, 4  ;;  %s2455_s30 = int_to_ptr.vmem [resolvable:$false] %s2454_s30 }
 0x1bd   : > { %v1267_v47 = vpop.f32.mrf.mxu1  ;;  %s2456_s24 = scalar_lea.vmem %s2455_s30, 16384  ;;  %p2457_p3 = scmp.lt.s32.totalorder %s3114_s20, %s2455_s30 }
 0x1be   : > { %1614 = vst [vmem:[%s2953_s11 + $0x20] sm:$0xff] %v1550_v39  ;;  %1616 = vst [vmem:[%s2953_s11 + $0x30] sm:$0xff] %v1552_v45  ;;  %v1555_v48 = vmax.f32 %v1273_v46, 0.0  ;;  %v1268_v49 = vadd.f32 %v2936_v21, %v1267_v47  ;;  %p2452_p1 = pnand %p2451_p0, %p2611_p4  ;;  %p2458_p5 = scmp.lt.s32.totalorder %s2456_s24, %s2450_s19 }
 0x1bf   : > { %v2251_v50 = vpop.f32.mrf.mxu1 }
 0x1c0   : > { %1619 = vst [vmem:[%s2953_s11 + $0x48] sm:$0xff] %v1555_v48  ;;  %v1554_v51 = vmax.f32 %v1268_v49, 0.0  ;;  %v1283_v52 = vadd.f32 %v2251_v50, %v2936_v21  ;;  %p2453_p2 = pneg %p2452_p1  ;;  %p2459_p6 = por %p2458_p5, %p2457_p3 }
 0x1c1   : > { %v1277_v53 = vpop.f32.mrf.mxu1 }
 0x1c2   : > { %1618 = vst [vmem:[%s2953_s11 + $0x40] sm:$0xff] %v1554_v51  ;;  %v1557_v54 = vmax.f32 %v1283_v52, 0.0  ;;  %v1278_v55 = vadd.f32 %v2936_v21, %v1277_v53  ;;  %p2460_p7 = pnand %p2459_p6, %p2453_p2 }
 0x1c3   : > { %v2254_v56 = vpop.f32.mrf.mxu1 }
 0x1c4   : > { %1621 = vst [vmem:[%s2953_s11 + $0x58] sm:$0xff] %v1557_v54  ;;  %v1556_v57 = vmax.f32 %v1278_v55, 0.0  ;;  %v1293_v58 = vadd.f32 %v2254_v56, %v2936_v21 }
 0x1c5   : > { %v1287_v59 = vpop.f32.mrf.mxu1 }
 0x1c6   : > { %1620 = vst [vmem:[%s2953_s11 + $0x50] sm:$0xff] %v1556_v57  ;;  %v1559_v60 = vmax.f32 %v1293_v58, 0.0  ;;  %v1288_v61 = vadd.f32 %v2936_v21, %v1287_v59 }
 0x1c7   : > { %v2257_v62 = vpop.f32.mrf.mxu1 }
 0x1c8   : > { %1623 = vst [vmem:[%s2953_s11 + $0x68] sm:$0xff] %v1559_v60  ;;  %v1558_v63 = vmax.f32 %v1288_v61, 0.0  ;;  %v1303_v0 = vadd.f32 %v2257_v62, %v2936_v21 }
 0x1c9   : > { %v1297_v1 = vpop.f32.mrf.mxu1 }
 0x1ca   : > { %1622 = vst [vmem:[%s2953_s11 + $0x60] sm:$0xff] %v1558_v63  ;;  %v1561_v2 = vmax.f32 %v1303_v0, 0.0  ;;  %v1298_v3 = vadd.f32 %v2936_v21, %v1297_v1 }
 0x1cb   : > { %v2260_v4 = vpop.f32.mrf.mxu1 }
 0x1cc   : > { %1625 = vst [vmem:[%s2953_s11 + $0x78] sm:$0xff] %v1561_v2  ;;  %v1560_v5 = vmax.f32 %v1298_v3, 0.0  ;;  %v1313_v6 = vadd.f32 %v2260_v4, %v2936_v21 }
 0x1cd   : > { %v1307_v7 = vpop.f32.mrf.mxu1 }
 0x1ce   : > { %1624 = vst [vmem:[%s2953_s11 + $0x70] sm:$0xff] %v1560_v5  ;;  %v1563_v8 = vmax.f32 %v1313_v6, 0.0  ;;  %v1308_v9 = vadd.f32 %v2936_v21, %v1307_v7 }
 0x1cf   : > { %v2263_v10 = vpop.f32.mrf.mxu1 }
 0x1d0   : > { %1627 = vst [vmem:[%s2953_s11 + $0x88] sm:$0xff] %v1563_v8  ;;  %v1562_v11 = vmax.f32 %v1308_v9, 0.0  ;;  %v1323_v12 = vadd.f32 %v2263_v10, %v2936_v21 }
 0x1d1   : > { %v1317_v13 = vpop.f32.mrf.mxu1 }
 0x1d2   : > { %1626 = vst [vmem:[%s2953_s11 + $0x80] sm:$0xff] %v1562_v11  ;;  %v1565_v14 = vmax.f32 %v1323_v12, 0.0  ;;  %v1318_v15 = vadd.f32 %v2936_v21, %v1317_v13 }
 0x1d3   : > { %v2266_v16 = vpop.f32.mrf.mxu1 }
 0x1d4   : > { %1629 = vst [vmem:[%s2953_s11 + $0x98] sm:$0xff] %v1565_v14  ;;  %v1564_v18 = vmax.f32 %v1318_v15, 0.0  ;;  %v1333_v19 = vadd.f32 %v2266_v16, %v2936_v21 }
 0x1d5   : > { %v1327_v20 = vpop.f32.mrf.mxu1 }
 0x1d6   : > { %1628 = vst [vmem:[%s2953_s11 + $0x90] sm:$0xff] %v1564_v18  ;;  %v1567_v22 = vmax.f32 %v1333_v19, 0.0  ;;  %v1328_v23 = vadd.f32 %v2936_v21, %v1327_v20 }
 0x1d7   : > { %v2269_v17 = vpop.f32.mrf.mxu1 }
 0x1d8   : > { %1631 = vst [vmem:[%s2953_s11 + $0xa8] sm:$0xff] %v1567_v22  ;;  %v1566_v24 = vmax.f32 %v1328_v23, 0.0  ;;  %v1343_v25 = vadd.f32 %v2269_v17, %v2936_v21 }
 0x1d9   : > { %v1337_v26 = vpop.f32.mrf.mxu1 }
 0x1da   : > { %1630 = vst [vmem:[%s2953_s11 + $0xa0] sm:$0xff] %v1566_v24  ;;  %v1569_v27 = vmax.f32 %v1343_v25, 0.0  ;;  %v1338_v28 = vadd.f32 %v2936_v21, %v1337_v26 }
 0x1db   : > { %v2272_v29 = vpop.f32.mrf.mxu1 }
 0x1dc   : > { %1633 = vst [vmem:[%s2953_s11 + $0xb8] sm:$0xff] %v1569_v27  ;;  %v1568_v30 = vmax.f32 %v1338_v28, 0.0  ;;  %v1353_v31 = vadd.f32 %v2272_v29, %v2936_v21 }
 0x1dd   : > { %v1347_v32 = vpop.f32.mrf.mxu1 }
 0x1de   : > { %1632 = vst [vmem:[%s2953_s11 + $0xb0] sm:$0xff] %v1568_v30  ;;  %v1571_v33 = vmax.f32 %v1353_v31, 0.0  ;;  %v1348_v34 = vadd.f32 %v2936_v21, %v1347_v32 }
 0x1df   : > { %v2275_v35 = vpop.f32.mrf.mxu1 }
 0x1e0   : > { %1635 = vst [vmem:[%s2953_s11 + $0xc8] sm:$0xff] %v1571_v33  ;;  %v1570_v36 = vmax.f32 %v1348_v34, 0.0  ;;  %v1363_v37 = vadd.f32 %v2275_v35, %v2936_v21 }
 0x1e1   : > { %v1357_v38 = vpop.f32.mrf.mxu1 }
 0x1e2   : > { %1634 = vst [vmem:[%s2953_s11 + $0xc0] sm:$0xff] %v1570_v36  ;;  %v1573_v39 = vmax.f32 %v1363_v37, 0.0  ;;  %v1358_v40 = vadd.f32 %v2936_v21, %v1357_v38 }
 0x1e3   : > { %v2278_v41 = vpop.f32.mrf.mxu1 }
 0x1e4   : > { %1637 = vst [vmem:[%s2953_s11 + $0xd8] sm:$0xff] %v1573_v39  ;;  %v1572_v42 = vmax.f32 %v1358_v40, 0.0  ;;  %v1373_v43 = vadd.f32 %v2278_v41, %v2936_v21 }
 0x1e5   : > { %v1367_v44 = vpop.f32.mrf.mxu1 }
 0x1e6   : > { %1636 = vst [vmem:[%s2953_s11 + $0xd0] sm:$0xff] %v1572_v42  ;;  %v1575_v45 = vmax.f32 %v1373_v43, 0.0  ;;  %v1368_v46 = vadd.f32 %v2936_v21, %v1367_v44 }
 0x1e7   : > { %v2281_v47 = vpop.f32.mrf.mxu1 }
 0x1e8   : > { %1639 = vst [vmem:[%s2953_s11 + $0xe8] sm:$0xff] %v1575_v45  ;;  %v1574_v48 = vmax.f32 %v1368_v46, 0.0  ;;  %v1383_v49 = vadd.f32 %v2281_v47, %v2936_v21 }
 0x1e9   : > { %v1377_v50 = vpop.f32.mrf.mxu1 }
 0x1ea   : > { %1638 = vst [vmem:[%s2953_s11 + $0xe0] sm:$0xff] %v1574_v48  ;;  %v1577_v51 = vmax.f32 %v1383_v49, 0.0  ;;  %v1378_v52 = vadd.f32 %v2936_v21, %v1377_v50 }
 0x1eb   : > { %v2284_v53 = vpop.f32.mrf.mxu1 }
 0x1ec   : > { %1641 = vst [vmem:[%s2953_s11 + $0xf8] sm:$0xff] %v1577_v51  ;;  %v1576_v54 = vmax.f32 %v1378_v52, 0.0  ;;  %v1393_v55 = vadd.f32 %v2284_v53, %v2936_v21 }
 0x1ed   : > { %v1387_v56 = vpop.f32.mrf.mxu1 }
 0x1ee   : > { %1640 = vst [vmem:[%s2953_s11 + $0xf0] sm:$0xff] %v1576_v54  ;;  %v1579_v57 = vmax.f32 %v1393_v55, 0.0  ;;  %v1388_v58 = vadd.f32 %v2936_v21, %v1387_v56 }
 0x1ef   : > { %v2287_v59 = vpop.f32.mrf.mxu1 }
 0x1f0   : > { %1643 = vst [vmem:[%s2953_s11 + $0x108] sm:$0xff] %v1579_v57  ;;  %v1578_v60 = vmax.f32 %v1388_v58, 0.0  ;;  %v1403_v61 = vadd.f32 %v2287_v59, %v2936_v21 }
 0x1f1   : > { %v1397_v62 = vpop.f32.mrf.mxu1 }
 0x1f2   : > { %1642 = vst [vmem:[%s2953_s11 + $0x100] sm:$0xff] %v1578_v60  ;;  %v1581_v63 = vmax.f32 %v1403_v61, 0.0  ;;  %v1398_v0 = vadd.f32 %v2936_v21, %v1397_v62 }
 0x1f3   : > { %v2290_v1 = vpop.f32.mrf.mxu1 }
 0x1f4   : > { %1645 = vst [vmem:[%s2953_s11 + $0x118] sm:$0xff] %v1581_v63  ;;  %v1580_v2 = vmax.f32 %v1398_v0, 0.0  ;;  %v1413_v3 = vadd.f32 %v2290_v1, %v2936_v21 }
 0x1f5   : > { %v1407_v4 = vpop.f32.mrf.mxu1 }
 0x1f6   : > { %1644 = vst [vmem:[%s2953_s11 + $0x110] sm:$0xff] %v1580_v2  ;;  %v1583_v5 = vmax.f32 %v1413_v3, 0.0  ;;  %v1408_v6 = vadd.f32 %v2936_v21, %v1407_v4 }
 0x1f7   : > { %v2293_v7 = vpop.f32.mrf.mxu1 }
 0x1f8   : > { %1647 = vst [vmem:[%s2953_s11 + $0x128] sm:$0xff] %v1583_v5  ;;  %v1582_v8 = vmax.f32 %v1408_v6, 0.0  ;;  %v1423_v9 = vadd.f32 %v2293_v7, %v2936_v21 }
 0x1f9   : > { %v1417_v10 = vpop.f32.mrf.mxu1 }
 0x1fa   : > { %1646 = vst [vmem:[%s2953_s11 + $0x120] sm:$0xff] %v1582_v8  ;;  %v1585_v11 = vmax.f32 %v1423_v9, 0.0  ;;  %v1418_v12 = vadd.f32 %v2936_v21, %v1417_v10 }
 0x1fb   : > { %v2296_v13 = vpop.f32.mrf.mxu1 }
 0x1fc   : > { %1649 = vst [vmem:[%s2953_s11 + $0x138] sm:$0xff] %v1585_v11  ;;  %v1584_v14 = vmax.f32 %v1418_v12, 0.0  ;;  %v1433_v15 = vadd.f32 %v2296_v13, %v2936_v21 }
 0x1fd   : > { %v1427_v16 = vpop.f32.mrf.mxu1 }
 0x1fe   : > { %1648 = vst [vmem:[%s2953_s11 + $0x130] sm:$0xff] %v1584_v14  ;;  %v1587_v18 = vmax.f32 %v1433_v15, 0.0  ;;  %v1428_v19 = vadd.f32 %v2936_v21, %v1427_v16 }
 0x1ff   : > { %v2299_v20 = vpop.f32.mrf.mxu1 }
 0x200   : > { %1651 = vst [vmem:[%s2953_s11 + $0x148] sm:$0xff] %v1587_v18  ;;  %v1586_v22 = vmax.f32 %v1428_v19, 0.0  ;;  %v1443_v23 = vadd.f32 %v2299_v20, %v2936_v21 }
 0x201   : > { %v1437_v17 = vpop.f32.mrf.mxu1 }
 0x202   : > { %1650 = vst [vmem:[%s2953_s11 + $0x140] sm:$0xff] %v1586_v22  ;;  %v1589_v24 = vmax.f32 %v1443_v23, 0.0  ;;  %v1438_v25 = vadd.f32 %v2936_v21, %v1437_v17 }
 0x203   : > { %v2302_v26 = vpop.f32.mrf.mxu1 }
 0x204   : > { %1653 = vst [vmem:[%s2953_s11 + $0x158] sm:$0xff] %v1589_v24  ;;  %v1588_v27 = vmax.f32 %v1438_v25, 0.0  ;;  %v1453_v28 = vadd.f32 %v2302_v26, %v2936_v21 }
 0x205   : > { %v1447_v29 = vpop.f32.mrf.mxu1 }
 0x206   : > { %1652 = vst [vmem:[%s2953_s11 + $0x150] sm:$0xff] %v1588_v27  ;;  %v1591_v30 = vmax.f32 %v1453_v28, 0.0  ;;  %v1448_v31 = vadd.f32 %v2936_v21, %v1447_v29 }
 0x207   : > { %v2305_v32 = vpop.f32.mrf.mxu1 }
 0x208   : > { %1655 = vst [vmem:[%s2953_s11 + $0x168] sm:$0xff] %v1591_v30  ;;  %v1590_v33 = vmax.f32 %v1448_v31, 0.0  ;;  %v1463_v34 = vadd.f32 %v2305_v32, %v2936_v21 }
 0x209   : > { %v1457_v35 = vpop.f32.mrf.mxu1 }
 0x20a   : > { %1654 = vst [vmem:[%s2953_s11 + $0x160] sm:$0xff] %v1590_v33  ;;  %v1593_v36 = vmax.f32 %v1463_v34, 0.0  ;;  %v1458_v37 = vadd.f32 %v2936_v21, %v1457_v35 }
 0x20b   : > { %v2308_v38 = vpop.f32.mrf.mxu1 }
 0x20c   : > { %1657 = vst [vmem:[%s2953_s11 + $0x178] sm:$0xff] %v1593_v36  ;;  %v1592_v39 = vmax.f32 %v1458_v37, 0.0  ;;  %v1473_v40 = vadd.f32 %v2308_v38, %v2936_v21 }
 0x20d   : > { %v1467_v41 = vpop.f32.mrf.mxu1 }
 0x20e   : > { %1656 = vst [vmem:[%s2953_s11 + $0x170] sm:$0xff] %v1592_v39  ;;  %v1595_v42 = vmax.f32 %v1473_v40, 0.0  ;;  %v1468_v43 = vadd.f32 %v2936_v21, %v1467_v41 }
 0x20f   : > { %v2311_v44 = vpop.f32.mrf.mxu1 }
 0x210   : > { %1659 = vst [vmem:[%s2953_s11 + $0x188] sm:$0xff] %v1595_v42  ;;  %v1594_v45 = vmax.f32 %v1468_v43, 0.0  ;;  %v1483_v46 = vadd.f32 %v2311_v44, %v2936_v21 }
 0x211   : > { %v1477_v47 = vpop.f32.mrf.mxu1 }
 0x212   : > { %1658 = vst [vmem:[%s2953_s11 + $0x180] sm:$0xff] %v1594_v45  ;;  %v1597_v48 = vmax.f32 %v1483_v46, 0.0  ;;  %v1478_v49 = vadd.f32 %v2936_v21, %v1477_v47 }
 0x213   : > { %v2314_v50 = vpop.f32.mrf.mxu1 }
 0x214   : > { %1661 = vst [vmem:[%s2953_s11 + $0x198] sm:$0xff] %v1597_v48  ;;  %v1596_v51 = vmax.f32 %v1478_v49, 0.0  ;;  %v1493_v52 = vadd.f32 %v2314_v50, %v2936_v21 }
 0x215   : > { %v1487_v53 = vpop.f32.mrf.mxu1 }
 0x216   : > { %1660 = vst [vmem:[%s2953_s11 + $0x190] sm:$0xff] %v1596_v51  ;;  %v1599_v54 = vmax.f32 %v1493_v52, 0.0  ;;  %v1488_v55 = vadd.f32 %v2936_v21, %v1487_v53 }
 0x217   : > { %v2317_v56 = vpop.f32.mrf.mxu1 }
 0x218   : > { %1663 = vst [vmem:[%s2953_s11 + $0x1a8] sm:$0xff] %v1599_v54  ;;  %v1598_v57 = vmax.f32 %v1488_v55, 0.0  ;;  %v1503_v58 = vadd.f32 %v2317_v56, %v2936_v21 }
 0x219   : > { %v1497_v59 = vpop.f32.mrf.mxu1 }
 0x21a   : > { %1662 = vst [vmem:[%s2953_s11 + $0x1a0] sm:$0xff] %v1598_v57  ;;  %v1601_v60 = vmax.f32 %v1503_v58, 0.0  ;;  %v1498_v61 = vadd.f32 %v2936_v21, %v1497_v59 }
 0x21b   : > { %v2320_v62 = vpop.f32.mrf.mxu1 }
 0x21c   : > { %1665 = vst [vmem:[%s2953_s11 + $0x1b8] sm:$0xff] %v1601_v60  ;;  %v1600_v63 = vmax.f32 %v1498_v61, 0.0  ;;  %v1513_v0 = vadd.f32 %v2320_v62, %v2936_v21 }
 0x21d   : > { %v1507_v1 = vpop.f32.mrf.mxu1 }
 0x21e   : > { %1664 = vst [vmem:[%s2953_s11 + $0x1b0] sm:$0xff] %v1600_v63  ;;  %v1603_v2 = vmax.f32 %v1513_v0, 0.0  ;;  %v1508_v3 = vadd.f32 %v2936_v21, %v1507_v1 }
 0x21f   : > { %v2323_v4 = vpop.f32.mrf.mxu1 }
 0x220   : > { %1667 = vst [vmem:[%s2953_s11 + $0x1c8] sm:$0xff] %v1603_v2  ;;  %v1602_v5 = vmax.f32 %v1508_v3, 0.0  ;;  %v1523_v6 = vadd.f32 %v2323_v4, %v2936_v21 }
 0x221   : > { %v1517_v7 = vpop.f32.mrf.mxu1 }
 0x222   : > { %1666 = vst [vmem:[%s2953_s11 + $0x1c0] sm:$0xff] %v1602_v5  ;;  %v1605_v8 = vmax.f32 %v1523_v6, 0.0  ;;  %v1518_v9 = vadd.f32 %v2936_v21, %v1517_v7 }
 0x223   : > { %v2326_v10 = vpop.f32.mrf.mxu1 }
 0x224   : > { %1669 = vst [vmem:[%s2953_s11 + $0x1d8] sm:$0xff] %v1605_v8  ;;  %v1604_v11 = vmax.f32 %v1518_v9, 0.0  ;;  %v1533_v12 = vadd.f32 %v2326_v10, %v2936_v21 }
 0x225   : > { %v1527_v13 = vpop.f32.mrf.mxu1 }
 0x226   : > { %1668 = vst [vmem:[%s2953_s11 + $0x1d0] sm:$0xff] %v1604_v11  ;;  %v1607_v14 = vmax.f32 %v1533_v12, 0.0  ;;  %v1528_v15 = vadd.f32 %v2936_v21, %v1527_v13 }
 0x227   : > { %v2329_v16 = vpop.f32.mrf.mxu1 }
 0x228   : > { %1671 = vst [vmem:[%s2953_s11 + $0x1e8] sm:$0xff] %v1607_v14  ;;  %v1606_v18 = vmax.f32 %v1528_v15, 0.0  ;;  %v1543_v19 = vadd.f32 %v2329_v16, %v2936_v21 }
 0x229   : > { %v1537_v20 = vpop.f32.mrf.mxu1 }
 0x22a   : > { %1670 = vst [vmem:[%s2953_s11 + $0x1e0] sm:$0xff] %v1606_v18  ;;  %v1609_v22 = vmax.f32 %v1543_v19, 0.0  ;;  %v1538_v23 = vadd.f32 %v2936_v21, %v1537_v20 }
 0x22c   : > { %1673 = vst [vmem:[%s2953_s11 + $0x1f8] sm:$0xff] %v1609_v22  ;;  %v1608_v17 = vmax.f32 %v1538_v23, 0.0 }
 0x22e   : > { %1672 = vst [vmem:[%s2953_s11 + $0x1f0] sm:$0xff] %v1608_v17 }
 0x22f   : > { %2463 = shalt.err (!%p2460_p7)
}
 0x230   : > { %s2464_s11 = scalar_lea.hbm %s3112_s18, 8192  ;;  %s2468_s27 = scalar_lea.hbm %s3169_s6, 24576 }
 0x231   : > { %p2465_p9 = scmp.ne.s32.totalorder %s3112_s18, %s2464_s11  ;;  %p2469_p12 = scmp.lt.s32.totalorder %s3112_s18, %s3169_s6 }
 0x232   : > { %p2470_p13 = scmp.lt.s32.totalorder %s2468_s27, %s2464_s11 }
 0x233   : > { %p2466_p10 = pnand %p2465_p9, %p2611_p4 }
 0x234   : > { %p2471_p0 = por %p2470_p13, %p2469_p12 }
 0x235   : > { %p2467_p11 = pneg %p2466_p10 }
 0x237   : > { %p2472_p1 = pnand %p2471_p0, %p2467_p11 }
 0x239   : > { %2475 = shalt.err (!%p2472_p1)
}
 0x23a   : > { %2363 = dma.vmem_to_hbm [thread:$0]  (%p2611_p4), %s3114_s20, 8192, %s3112_s18, %s1680_s15, %s2533_s13, %s2533_s13, %s2534_s17  }
 0x23b PF: > { %p2373_p2 = scmp.ge.s32.totalorder %s2530_s26, 2  ;;  %s1728_s19 = sand.u32 1, %s2510_s21  }
 0x23c   : > { %s1729_s28 = scalar_lea.sflag [#allocation3], %s1728_s19 }
 0x23d   : > { %p2367_p3 = pnand %p2373_p2, %p2618_p8 }
 0x23f   : > { %p2368_p5 = pneg %p2367_p3 }
 0x241   : > { %2501 = dma.done.wait (%p2368_p5), %s1729_s28, 8192  }
 0x242   : > { %2503 = vsyncadd (%p2368_p5), %s1729_s28, 4294959104  ;;  %s1738_s30 = scalar_lea.sflag [#allocation5], %s1728_s19 }
 0x243   : > { %2505 = dma.done.wait (%p2368_p5), %s1738_s30, 8192  }
 0x244   : > { %2507 = vsyncadd (%p2368_p5), %s1738_s30, 4294959104  ;;  %s23_s26 = sadd.s32 1, %s2530_s26   ;;  %s3174_s21 = smov %s2514_s22 }
 0x245   : > { %p20_p6 = scmp.ge.s32.totalorder %s23_s26, 5   ;;  %s3175_s22 = smov %s2518_s23 }
 0x246   : > { %s3176_s23 = smov %s2624_s10  ;;  %s3177_s24 = smov %s2526_s25 }
 0x247   : > { %s3178_s25 = smov %s3180_s29  ;;  %22 = sbr.rel (!%p20_p6) target bundleno = 6 (0x6), region = 104 }
 0x24c   :  { %1743 = vsyncpa [#allocation3], 1 }
 0x24d   :  { %1745 = vsyncpa [#allocation3 + $0x1], 1 }
 0x24e   :  { %1746 = vsyncpa [#allocation5], 1 }
 0x24f   :  { %1748 = vsyncpa [#allocation5 + $0x1], 1 }

</bundles_post_ra>
